<compile_context>
chip_gen: v7x
topology: tpu7x:2x2x1
jax: 0.10.0
libtpu: 0.0.40
codegen_flags: <defaults>
</compile_context>

<pallas_src>
import math
import numpy as np

import jax
import jax.numpy as jnp
from jax.experimental import pallas as pl
from jax.experimental.pallas import tpu as pltpu

EPS = 1e-5
T_CHUNK = 8  # scan chunk = one sublane tile


# ----------------------------------------------------------------------------- helpers
def _silu(v):
    return v * (1.0 / (1.0 + jnp.exp(-v)))


def _softplus(v):
    # matches torch.nn.functional.softplus (threshold=20)
    return jnp.where(v > 20.0, v, jnp.log(1.0 + jnp.exp(jnp.minimum(v, 20.0))))


# ----------------------------------------------------------------------------- kernel
def pmamba_encoder_kernel(
    x_ref,      # (1, L, d_model)            encoder input (read only at layer 0)
    nw_ref,     # (1, 1, d_model)            this layer's RMSNorm weight
    wxzT_ref,   # (1, d_model, 2*d_ff)       fused in_proj (x | z), transposed
    wdT_ref,    # (1, d_ff, dt_rank)         x_proj delta-part, transposed
    wbc_ref,    # (1, 2*d_state, d_ff)       fused x_proj (B ; C), torch layout
    wdtT_ref,   # (1, dt_rank, d_ff)         dt_proj weight, transposed
    bdt_ref,    # (1, 1, d_ff)               dt_proj bias
    aneg_ref,   # (1, d_state, 1)            A = -exp(A_log), precomputed on host
    woutT_ref,  # (1, d_ff, d_model)         out_proj, transposed
    nwf_ref,    # (1, d_model)               final RMSNorm weight
    o_ref,      # (1, L, d_model)            output / VMEM-resident residual stream
):
    l = pl.program_id(1)
    n_layers = pl.num_programs(1)

    # Initialise the residual stream (resident in the output block across the
    # "arbitrary" layer axis) from the encoder input on the first layer.
    @pl.when(l == 0)
    def _():
        o_ref[...] = x_ref[...]

    xb = o_ref[0]                                    # (L, d_model) residual stream
    L = xb.shape[0]
    d_ff = wdT_ref.shape[1]
    d_state = aneg_ref.shape[1]

    # ---- RMSNorm ----
    ms = jnp.mean(xb * xb, axis=-1, keepdims=True)                     # (L, 1)
    xn = xb * jax.lax.rsqrt(ms + EPS) * nw_ref[0]                      # (L, d_model)

    # ---- fused in_proj + SiLU ----
    xz = jnp.dot(xn, wxzT_ref[0], preferred_element_type=jnp.float32)  # (L, 2*d_ff)
    xh = _silu(xz[:, :d_ff])                                           # (L, d_ff)
    zg = _silu(xz[:, d_ff:])                                           # (L, d_ff)

    # ---- x_proj: delta low-rank (time-major) + fused B/C (state-major) ----
    dr = jnp.dot(xh, wdT_ref[0], preferred_element_type=jnp.float32)   # (L, dt_rank)
    delta = _softplus(
        jnp.dot(dr, wdtT_ref[0], preferred_element_type=jnp.float32)
        + bdt_ref[0])                                                  # (L, d_ff)
    # One dot_general contracting d_ff gives B^T and C^T directly in the state-major
    # orientation the recurrence consumes (no transposes on the activation path).
    bc_t = jax.lax.dot_general(wbc_ref[0], xh, (((1,), (1,)), ((), ())),
                               preferred_element_type=jnp.float32)     # (2*d_state, L)
    B_t = bc_t[:d_state]                                               # (d_state, L)
    C_t = bc_t[d_state:]                                               # (d_state, L)

    A3 = aneg_ref[...]                                                 # (1, d_state, 1)
    dx = delta * xh                                                    # (L, d_ff)

    # ---- chunked selective scan ----
    # h[s, f] = exp(A[s]*delta[t,f]) * h[s, f] + B[t,s]*delta[t,f]*x[t,f]
    # y[t, f] = sum_s C[t,s] * h[s, f]
    # exp / B*delta*x / the C-reduce are batched per 8-step chunk OFF the serial
    # chain; the recurrence body itself is a pure multiply-add.
    # TODO(synk): at production L, turn the chunk loop into lax.fori_loop writing
    #             y chunks into a VMEM scratch (bounds code size & live ranges).
    tcs = T_CHUNK if L >= T_CHUNK else L
    h = jnp.zeros((d_state, d_ff), dtype=jnp.float32)
    y_chunks = []
    for c0 in range(0, L, tcs):
        tc = min(tcs, L - c0)
        # Batched per-chunk precompute (built from row/column slices + leading-axis
        # stacks so every reshape stays on safe layout paths).
        d3  = jnp.stack([delta[c0 + t:c0 + t + 1, :] for t in range(tc)], axis=0)  # (tc,1,d_ff)
        dx3 = jnp.stack([dx[c0 + t:c0 + t + 1, :] for t in range(tc)], axis=0)     # (tc,1,d_ff)
        B3  = jnp.stack([B_t[:, c0 + t:c0 + t + 1] for t in range(tc)], axis=0)    # (tc,ds,1)
        C3  = jnp.stack([C_t[:, c0 + t:c0 + t + 1] for t in range(tc)], axis=0)    # (tc,ds,1)
        dA3 = jnp.exp(d3 * A3)                                # (tc, d_state, d_ff)
        BX3 = B3 * dx3                                        # (tc, d_state, d_ff)

        hs = []
        for t in range(tc):                                   # serial chain: mul+add only
            h = dA3[t] * h + BX3[t]
            hs.append(h)
        hs3 = jnp.stack(hs, axis=0)                           # (tc, d_state, d_ff)
        y_chunks.append(jnp.sum(C3 * hs3, axis=1))            # (tc, d_ff)
    y = y_chunks[0] if len(y_chunks) == 1 else jnp.concatenate(y_chunks, axis=0)

    # ---- gate, out_proj, residual ----
    out = jnp.dot(y * zg, woutT_ref[0], preferred_element_type=jnp.float32)  # (L, d_model)
    xb_new = out + xb

    @pl.when(l < n_layers - 1)
    def _():
        o_ref[0] = xb_new

    # Final RMSNorm fused into the last layer's grid step.
    @pl.when(l == n_layers - 1)
    def _():
        ms2 = jnp.mean(xb_new * xb_new, axis=-1, keepdims=True)
        o_ref[0] = xb_new * jax.lax.rsqrt(ms2 + EPS) * nwf_ref[...]


# ----------------------------------------------------------------------------- wrapper
def pmamba_encoder(x, layer_params, norm_f_w):
    B, L, d_model = x.shape
    e_layers = len(layer_params)

    # Per-layer weights stacked along a leading layer axis (done once, outside the
    # kernel); in_proj and x_proj(B,C) are fused here, A = -exp(A_log) precomputed.
    nw_s    = jnp.stack([p["nw"] for p in layer_params], axis=0)
    wxzT_s  = jnp.stack([jnp.concatenate([p["wxT"], p["wzT"]], axis=-1)
                         for p in layer_params], axis=0)
    wdT_s   = jnp.stack([p["wdT"] for p in layer_params], axis=0)
    wbc_s   = jnp.stack([jnp.concatenate([p["wB"], p["wC"]], axis=0)
                         for p in layer_params], axis=0)
    wdtT_s  = jnp.stack([p["wdtT"] for p in layer_params], axis=0)
    bdt_s   = jnp.stack([p["bdt"] for p in layer_params], axis=0)
    aneg_s  = jnp.stack([-jnp.exp(p["Acol"]) for p in layer_params], axis=0)
    woutT_s = jnp.stack([p["woutT"] for p in layer_params], axis=0)

    def layer_spec(a):
        # One layer's slice per grid step along the (arbitrary) layer axis; only this
        # layer's weights are resident in VMEM, the next layer's are prefetched.
        blk = (1,) + a.shape[1:]
        nz = a.ndim - 1
        return pl.BlockSpec(blk, lambda b, l, _n=nz: (l,) + (0,) * _n)

    in_specs = [
        pl.BlockSpec((1, L, d_model), lambda b, l: (b, 0, 0)),   # x
        layer_spec(nw_s), layer_spec(wxzT_s), layer_spec(wdT_s),
        layer_spec(wbc_s), layer_spec(wdtT_s), layer_spec(bdt_s),
        layer_spec(aneg_s), layer_spec(woutT_s),
        pl.BlockSpec(norm_f_w.shape, lambda b, l: (0, 0)),       # final norm weight
    ]

    return pl.pallas_call(
        pmamba_encoder_kernel,
        out_shape=jax.ShapeDtypeStruct((B, L, d_model), jnp.float32),
        grid_spec=pltpu.PrefetchScalarGridSpec(
            num_scalar_prefetch=0,
            grid=(B, e_layers),
            in_specs=in_specs,
            out_specs=pl.BlockSpec((1, L, d_model), lambda b, l: (b, 0, 0)),
        ),
        compiler_params=pltpu.CompilerParams(
            dimension_semantics=("parallel", "arbitrary")),
    )(x, nw_s, wxzT_s, wdT_s, wbc_s, wdtT_s, bdt_s, aneg_s, woutT_s, norm_f_w)


# ----------------------------------------------------------------------------- params
def init_layer_params(key, d_model, d_ff, d_state, dt_rank,
                      dt_scale=1.0, dt_min=0.001, dt_max=0.1, dt_init_floor=1e-4):
    ks = jax.random.split(key, 5)
    lim_in = 1.0 / math.sqrt(d_model)
    W_in = jax.random.uniform(ks[0], (2 * d_ff, d_model), jnp.float32, -lim_in, lim_in)
    lim_x = 1.0 / math.sqrt(d_ff)
    W_xp = jax.random.uniform(ks[1], (dt_rank + 2 * d_state + d_ff, d_ff),
                              jnp.float32, -lim_x, lim_x)
    dt_init_std = dt_rank ** (-0.5) * dt_scale
    W_dt = jax.random.uniform(ks[2], (d_ff, dt_rank), jnp.float32,
                              -dt_init_std, dt_init_std)
    dt = jnp.exp(jax.random.uniform(ks[3], (d_ff,), jnp.float32)
                 * (math.log(dt_max) - math.log(dt_min)) + math.log(dt_min))
    dt = jnp.maximum(dt, dt_init_floor)
    inv_dt = dt + jnp.log(-jnp.expm1(-dt))
    A_log = jnp.log(jnp.arange(1, d_state + 1, dtype=jnp.float32))       # (d_state,)
    W_out = jax.random.uniform(ks[4], (d_model, d_ff), jnp.float32, -lim_x, lim_x)
    norm_w = jnp.ones((d_model,), jnp.float32)

    wx = W_in[:d_ff]                       # (d_ff, d_model)
    wz = W_in[d_ff:]
    wd = W_xp[:dt_rank]                    # (dt_rank, d_ff)
    wB = W_xp[dt_rank:dt_rank + d_state]   # (d_state, d_ff)
    wC = W_xp[dt_rank + d_state:dt_rank + 2 * d_state]

    return dict(
        nw=norm_w[None, :],
        wxT=wx.T, wzT=wz.T,
        wdT=wd.T, wdtT=W_dt.T, bdt=inv_dt[None, :],
        wB=wB, wC=wC, Acol=A_log[:, None], woutT=W_out.T,
    )


# ----------------------------------------------------------------------------- reference
def _ref_layer(x, p):
    w = p["nw"][0]
    ms = jnp.mean(x * x, axis=-1, keepdims=True)
    xn = x * jax.lax.rsqrt(ms + EPS) * w
    hp = jnp.dot(xn, p["wxT"], precision="highest")
    zp = jnp.dot(xn, p["wzT"], precision="highest")
    xh = hp * jax.nn.sigmoid(hp)
    z = zp * jax.nn.sigmoid(zp)
    dr = jnp.dot(xh, p["wdT"], precision="highest")
    delta = jax.nn.softplus(jnp.dot(dr, p["wdtT"], precision="highest") + p["bdt"][0])
    Bm = jnp.einsum("blf,sf->bls", xh, p["wB"], precision="highest")
    Cm = jnp.einsum("blf,sf->bls", xh, p["wC"], precision="highest")
    A = -jnp.exp(p["Acol"][:, 0])
    deltaA = jnp.exp(delta[..., None] * A)                         # (B,L,d_ff,d_state)
    BX = delta[..., None] * Bm[:, :, None, :] * xh[..., None]

    def step(h, inp):
        dA_t, bx_t = inp
        h = dA_t * h + bx_t
        return h, h

    Bsz, _, d_ff = xh.shape
    d_state = A.shape[0]
    h0 = jnp.zeros((Bsz, d_ff, d_state), jnp.float32)
    _, hs = jax.lax.scan(step, h0, (jnp.moveaxis(deltaA, 1, 0), jnp.moveaxis(BX, 1, 0)))
    hs = jnp.moveaxis(hs, 0, 1)
    y = jnp.einsum("blfs,bls->blf", hs, Cm, precision="highest")
    out = jnp.dot(y * z, p["woutT"], precision="highest")
    return out + x


def _ref_encoder(x, layer_params, norm_f_w):
    for p in layer_params:
        x = _ref_layer(x, p)
    ms = jnp.mean(x * x, axis=-1, keepdims=True)
    return x * jax.lax.rsqrt(ms + EPS) * norm_f_w[0]


# ----------------------------------------------------------------------------- main
if __name__ == "__main__":
    B, L = 2, 8
    d_model, d_ff, d_state, dt_rank, e_layers = 32, 32, 16, 4, 2

    key = jax.random.PRNGKey(0)
    kx, *klayers = jax.random.split(key, 1 + e_layers)
    x = jax.random.normal(kx, (B, L, d_model), jnp.float32)

    layer_params = [init_layer_params(k, d_model, d_ff, d_state, dt_rank) for k in klayers]
    norm_f_w = jnp.ones((1, d_model), jnp.float32)

    out = jax.jit(pmamba_encoder)(x, layer_params, norm_f_w)
    out = jax.block_until_ready(out)

    ref = _ref_encoder(x, layer_params, norm_f_w)
    assert out.shape == (B, L, d_model)
    err = float(np.max(np.abs(np.asarray(out) - np.asarray(ref))))
    assert np.allclose(np.asarray(out), np.asarray(ref), rtol=2e-3, atol=2e-3), err

    print("KERNEL_OK")
</pallas_src>

<mosaic_0001>
module attributes {stable_mosaic.version = 11 : i64} {
  func.func @pmamba_encoder_kernel(%arg0: i32, %arg1: i32, %arg2: memref<1x8x32xf32, #tpu.memory_space<vmem>>, %arg3: memref<1x1x32xf32, #tpu.memory_space<vmem>>, %arg4: memref<1x32x64xf32, #tpu.memory_space<vmem>>, %arg5: memref<1x32x4xf32, #tpu.memory_space<vmem>>, %arg6: memref<1x32x32xf32, #tpu.memory_space<vmem>>, %arg7: memref<1x4x32xf32, #tpu.memory_space<vmem>>, %arg8: memref<1x1x32xf32, #tpu.memory_space<vmem>>, %arg9: memref<1x16x1xf32, #tpu.memory_space<vmem>>, %arg10: memref<1x32x32xf32, #tpu.memory_space<vmem>>, %arg11: memref<1x32xf32, #tpu.memory_space<vmem>>, %arg12: memref<1x8x32xf32, #tpu.memory_space<vmem>>) attributes {dimension_semantics = [#tpu.dimension_semantics<parallel>, #tpu.dimension_semantics<arbitrary>], iteration_bounds = array<i64: 2, 2>, scalar_prefetch = 0 : i64, scratch_operands = 0 : i64, tpu.core_type = #tpu.core_type<tc>, window_params = [{transform_indices = @transform_0, window_bounds = array<i64: 1, 8, 32>}, {transform_indices = @transform_1, window_bounds = array<i64: 1, 1, 32>}, {transform_indices = @transform_2, window_bounds = array<i64: 1, 32, 64>}, {transform_indices = @transform_3, window_bounds = array<i64: 1, 32, 4>}, {transform_indices = @transform_4, window_bounds = array<i64: 1, 32, 32>}, {transform_indices = @transform_5, window_bounds = array<i64: 1, 4, 32>}, {transform_indices = @transform_6, window_bounds = array<i64: 1, 1, 32>}, {transform_indices = @transform_7, window_bounds = array<i64: 1, 16, 1>}, {transform_indices = @transform_8, window_bounds = array<i64: 1, 32, 32>}, {pipeline_mode = #tpu.pipeline_mode<synchronous>, transform_indices = @transform_9, window_bounds = array<i64: 1, 32>}, {transform_indices = @transform_10, window_bounds = array<i64: 1, 8, 32>}]} {
    %c0_i32 = arith.constant 0 : i32
    %0 = arith.cmpi eq, %arg1, %c0_i32 : i32
    %1 = arith.extui %0 : i1 to i32
    %c0_i32_0 = arith.constant 0 : i32
    %2 = arith.cmpi ne, %1, %c0_i32_0 : i32
    scf.if %2 {
      %c0_48 = arith.constant 0 : index
      %c0_49 = arith.constant 0 : index
      %c0_50 = arith.constant 0 : index
      %213 = vector.load %arg2[%c0_48, %c0_49, %c0_50] : memref<1x8x32xf32, #tpu.memory_space<vmem>>, vector<1x8x32xf32>
      %c0_51 = arith.constant 0 : index
      %c0_52 = arith.constant 0 : index
      %c0_53 = arith.constant 0 : index
      %214 = vector.load %arg12[%c0_51, %c0_52, %c0_53] : memref<1x8x32xf32, #tpu.memory_space<vmem>>, vector<1x8x32xf32>
      tpu.vector_store %arg12[%c0_51, %c0_52, %c0_53], %213 {strides = array<i32>} : memref<1x8x32xf32, #tpu.memory_space<vmem>>, vector<1x8x32xf32>,
    } else {
    }
    %c0 = arith.constant 0 : index
    %c0_1 = arith.constant 0 : index
    %c0_2 = arith.constant 0 : index
    %3 = vector.load %arg12[%c0, %c0_1, %c0_2] : memref<1x8x32xf32, #tpu.memory_space<vmem>>, vector<1x8x32xf32>
    %4 = vector.shape_cast %3 : vector<1x8x32xf32> to vector<8x32xf32>
    %5 = arith.mulf %4, %4 : vector<8x32xf32>
    %cst = arith.constant dense<0.000000e+00> : vector<8xf32>
    %6 = vector.multi_reduction <add>, %5, %cst [1] : vector<8x32xf32> to vector<8xf32>
    %7 = vector.shape_cast %6 : vector<8xf32> to vector<8x1xf32>
    %cst_3 = arith.constant 3.200000e+01 : f32
    %8 = vector.broadcast %cst_3 : f32 to vector<8x1xf32>
    %9 = arith.divf %7, %8 : vector<8x1xf32>
    %cst_4 = arith.constant 9.99999974E-6 : f32
    %10 = vector.broadcast %cst_4 : f32 to vector<8x1xf32>
    %11 = arith.addf %9, %10 : vector<8x1xf32>
    %12 = math.rsqrt %11 : vector<8x1xf32>
    %13 = vector.broadcast %12 : vector<8x1xf32> to vector<8x32xf32>
    %14 = arith.mulf %4, %13 : vector<8x32xf32>
    %c0_5 = arith.constant 0 : index
    %c0_6 = arith.constant 0 : index
    %c0_7 = arith.constant 0 : index
    %15 = vector.load %arg3[%c0_5, %c0_6, %c0_7] : memref<1x1x32xf32, #tpu.memory_space<vmem>>, vector<1x1x32xf32>
    %16 = vector.shape_cast %15 : vector<1x1x32xf32> to vector<1x32xf32>
    %17 = vector.broadcast %16 : vector<1x32xf32> to vector<8x32xf32>
    %18 = arith.mulf %14, %17 : vector<8x32xf32>
    %c0_8 = arith.constant 0 : index
    %c0_9 = arith.constant 0 : index
    %c0_10 = arith.constant 0 : index
    %19 = vector.load %arg4[%c0_8, %c0_9, %c0_10] : memref<1x32x64xf32, #tpu.memory_space<vmem>>, vector<1x32x64xf32>
    %20 = vector.shape_cast %19 : vector<1x32x64xf32> to vector<32x64xf32>
    %cst_11 = arith.constant dense<0.000000e+00> : vector<8x64xf32>
    %21 = tpu.matmul %18, %20, %cst_11 {dimension_numbers = #tpu.dot_dimension_numbers<[1], [0], [0], [1], [0, 0, 1, 1], [], []>} : vector<8x32xf32>, vector<32x64xf32>, vector<8x64xf32> -> vector<8x64xf32>
    %22 = vector.extract_strided_slice %21 {offsets = [0, 0], sizes = [8, 32], strides = [1, 1]} : vector<8x64xf32> to vector<8x32xf32>
    %cst_12 = arith.constant 0.000000e+00 : f32
    %23 = vector.broadcast %cst_12 : f32 to vector<8x32xf32>
    %24 = arith.subf %23, %22 : vector<8x32xf32>
    %25 = math.exp %24 : vector<8x32xf32>
    %cst_13 = arith.constant 1.000000e+00 : f32
    %26 = vector.broadcast %cst_13 : f32 to vector<8x32xf32>
    %27 = arith.addf %26, %25 : vector<8x32xf32>
    %cst_14 = arith.constant 1.000000e+00 : f32
    %28 = vector.broadcast %cst_14 : f32 to vector<8x32xf32>
    %29 = arith.divf %28, %27 : vector<8x32xf32>
    %30 = arith.mulf %22, %29 : vector<8x32xf32>
    %31 = vector.extract_strided_slice %21 {offsets = [0, 32], sizes = [8, 32], strides = [1, 1]} : vector<8x64xf32> to vector<8x32xf32>
    %cst_15 = arith.constant 0.000000e+00 : f32
    %32 = vector.broadcast %cst_15 : f32 to vector<8x32xf32>
    %33 = arith.subf %32, %31 : vector<8x32xf32>
    %34 = math.exp %33 : vector<8x32xf32>
    %cst_16 = arith.constant 1.000000e+00 : f32
    %35 = vector.broadcast %cst_16 : f32 to vector<8x32xf32>
    %36 = arith.addf %35, %34 : vector<8x32xf32>
    %cst_17 = arith.constant 1.000000e+00 : f32
    %37 = vector.broadcast %cst_17 : f32 to vector<8x32xf32>
    %38 = arith.divf %37, %36 : vector<8x32xf32>
    %39 = arith.mulf %31, %38 : vector<8x32xf32>
    %c0_18 = arith.constant 0 : index
    %c0_19 = arith.constant 0 : index
    %c0_20 = arith.constant 0 : index
    %40 = vector.load %arg5[%c0_18, %c0_19, %c0_20] : memref<1x32x4xf32, #tpu.memory_space<vmem>>, vector<1x32x4xf32>
    %41 = vector.shape_cast %40 : vector<1x32x4xf32> to vector<32x4xf32>
    %cst_21 = arith.constant dense<0.000000e+00> : vector<8x4xf32>
    %42 = tpu.matmul %30, %41, %cst_21 {dimension_numbers = #tpu.dot_dimension_numbers<[1], [0], [0], [1], [0, 0, 1, 1], [], []>} : vector<8x32xf32>, vector<32x4xf32>, vector<8x4xf32> -> vector<8x4xf32>
    %c0_22 = arith.constant 0 : index
    %c0_23 = arith.constant 0 : index
    %c0_24 = arith.constant 0 : index
    %43 = vector.load %arg7[%c0_22, %c0_23, %c0_24] : memref<1x4x32xf32, #tpu.memory_space<vmem>>, vector<1x4x32xf32>
    %44 = vector.shape_cast %43 : vector<1x4x32xf32> to vector<4x32xf32>
    %cst_25 = arith.constant dense<0.000000e+00> : vector<8x32xf32>
    %45 = tpu.matmul %42, %44, %cst_25 {dimension_numbers = #tpu.dot_dimension_numbers<[1], [0], [0], [1], [0, 0, 1, 1], [], []>} : vector<8x4xf32>, vector<4x32xf32>, vector<8x32xf32> -> vector<8x32xf32>
    %c0_26 = arith.constant 0 : index
    %c0_27 = arith.constant 0 : index
    %c0_28 = arith.constant 0 : index
    %46 = vector.load %arg8[%c0_26, %c0_27, %c0_28] : memref<1x1x32xf32, #tpu.memory_space<vmem>>, vector<1x1x32xf32>
    %47 = vector.shape_cast %46 : vector<1x1x32xf32> to vector<1x32xf32>
    %48 = vector.broadcast %47 : vector<1x32xf32> to vector<8x32xf32>
    %49 = arith.addf %45, %48 : vector<8x32xf32>
    %cst_29 = arith.constant 2.000000e+01 : f32
    %50 = vector.broadcast %cst_29 : f32 to vector<8x32xf32>
    %51 = arith.cmpf ogt, %49, %50 : vector<8x32xf32>
    %cst_30 = arith.constant 2.000000e+01 : f32
    %52 = vector.broadcast %cst_30 : f32 to vector<8x32xf32>
    %53 = arith.minimumf %49, %52 : vector<8x32xf32>
    %54 = math.exp %53 : vector<8x32xf32>
    %cst_31 = arith.constant 1.000000e+00 : f32
    %55 = vector.broadcast %cst_31 : f32 to vector<8x32xf32>
    %56 = arith.addf %55, %54 : vector<8x32xf32>
    %57 = math.log %56 : vector<8x32xf32>
    %58 = arith.select %51, %49, %57 : vector<8x32xi1>, vector<8x32xf32>
    %c0_32 = arith.constant 0 : index
    %c0_33 = arith.constant 0 : index
    %c0_34 = arith.constant 0 : index
    %59 = vector.load %arg6[%c0_32, %c0_33, %c0_34] : memref<1x32x32xf32, #tpu.memory_space<vmem>>, vector<1x32x32xf32>
    %60 = vector.shape_cast %59 : vector<1x32x32xf32> to vector<32x32xf32>
    %cst_35 = arith.constant dense<0.000000e+00> : vector<32x8xf32>
    %61 = tpu.matmul %60, %30, %cst_35 {dimension_numbers = #tpu.dot_dimension_numbers<[1], [1], [0], [0], [0, 0, 1, 0], [], []>} : vector<32x32xf32>, vector<8x32xf32>, vector<32x8xf32> -> vector<32x8xf32>
    %62 = vector.extract_strided_slice %61 {offsets = [0, 0], sizes = [16, 8], strides = [1, 1]} : vector<32x8xf32> to vector<16x8xf32>
    %63 = vector.extract_strided_slice %61 {offsets = [16, 0], sizes = [16, 8], strides = [1, 1]} : vector<32x8xf32> to vector<16x8xf32>
    %c0_36 = arith.constant 0 : index
    %c0_37 = arith.constant 0 : index
    %c0_38 = arith.constant 0 : index
    %64 = vector.load %arg9[%c0_36, %c0_37, %c0_38] : memref<1x16x1xf32, #tpu.memory_space<vmem>>, vector<1x16x1xf32>
    %65 = arith.mulf %58, %30 : vector<8x32xf32>
    %cst_39 = arith.constant 0.000000e+00 : f32
    %66 = vector.broadcast %cst_39 : f32 to vector<16x32xf32>
    %67 = vector.extract_strided_slice %58 {offsets = [0, 0], sizes = [1, 32], strides = [1, 1]} : vector<8x32xf32> to vector<1x32xf32>
    %68 = vector.extract_strided_slice %58 {offsets = [1, 0], sizes = [1, 32], strides = [1, 1]} : vector<8x32xf32> to vector<1x32xf32>
    %69 = vector.extract_strided_slice %58 {offsets = [2, 0], sizes = [1, 32], strides = [1, 1]} : vector<8x32xf32> to vector<1x32xf32>
    %70 = vector.extract_strided_slice %58 {offsets = [3, 0], sizes = [1, 32], strides = [1, 1]} : vector<8x32xf32> to vector<1x32xf32>
    %71 = vector.extract_strided_slice %58 {offsets = [4, 0], sizes = [1, 32], strides = [1, 1]} : vector<8x32xf32> to vector<1x32xf32>
    %72 = vector.extract_strided_slice %58 {offsets = [5, 0], sizes = [1, 32], strides = [1, 1]} : vector<8x32xf32> to vector<1x32xf32>
    %73 = vector.extract_strided_slice %58 {offsets = [6, 0], sizes = [1, 32], strides = [1, 1]} : vector<8x32xf32> to vector<1x32xf32>
    %74 = vector.extract_strided_slice %58 {offsets = [7, 0], sizes = [1, 32], strides = [1, 1]} : vector<8x32xf32> to vector<1x32xf32>
    %75 = vector.shape_cast %67 : vector<1x32xf32> to vector<1x1x32xf32>
    %76 = vector.shape_cast %68 : vector<1x32xf32> to vector<1x1x32xf32>
    %77 = vector.shape_cast %69 : vector<1x32xf32> to vector<1x1x32xf32>
    %78 = vector.shape_cast %70 : vector<1x32xf32> to vector<1x1x32xf32>
    %79 = vector.shape_cast %71 : vector<1x32xf32> to vector<1x1x32xf32>
    %80 = vector.shape_cast %72 : vector<1x32xf32> to vector<1x1x32xf32>
    %81 = vector.shape_cast %73 : vector<1x32xf32> to vector<1x1x32xf32>
    %82 = vector.shape_cast %74 : vector<1x32xf32> to vector<1x1x32xf32>
    %83 = tpu.concatenate %75, %76, %77, %78, %79, %80, %81, %82 in 0 : vector<1x1x32xf32>, vector<1x1x32xf32>, vector<1x1x32xf32>, vector<1x1x32xf32>, vector<1x1x32xf32>, vector<1x1x32xf32>, vector<1x1x32xf32>, vector<1x1x32xf32> -> vector<8x1x32xf32>
    %84 = vector.extract_strided_slice %65 {offsets = [0, 0], sizes = [1, 32], strides = [1, 1]} : vector<8x32xf32> to vector<1x32xf32>
    %85 = vector.extract_strided_slice %65 {offsets = [1, 0], sizes = [1, 32], strides = [1, 1]} : vector<8x32xf32> to vector<1x32xf32>
    %86 = vector.extract_strided_slice %65 {offsets = [2, 0], sizes = [1, 32], strides = [1, 1]} : vector<8x32xf32> to vector<1x32xf32>
    %87 = vector.extract_strided_slice %65 {offsets = [3, 0], sizes = [1, 32], strides = [1, 1]} : vector<8x32xf32> to vector<1x32xf32>
    %88 = vector.extract_strided_slice %65 {offsets = [4, 0], sizes = [1, 32], strides = [1, 1]} : vector<8x32xf32> to vector<1x32xf32>
    %89 = vector.extract_strided_slice %65 {offsets = [5, 0], sizes = [1, 32], strides = [1, 1]} : vector<8x32xf32> to vector<1x32xf32>
    %90 = vector.extract_strided_slice %65 {offsets = [6, 0], sizes = [1, 32], strides = [1, 1]} : vector<8x32xf32> to vector<1x32xf32>
    %91 = vector.extract_strided_slice %65 {offsets = [7, 0], sizes = [1, 32], strides = [1, 1]} : vector<8x32xf32> to vector<1x32xf32>
    %92 = vector.shape_cast %84 : vector<1x32xf32> to vector<1x1x32xf32>
    %93 = vector.shape_cast %85 : vector<1x32xf32> to vector<1x1x32xf32>
    %94 = vector.shape_cast %86 : vector<1x32xf32> to vector<1x1x32xf32>
    %95 = vector.shape_cast %87 : vector<1x32xf32> to vector<1x1x32xf32>
    %96 = vector.shape_cast %88 : vector<1x32xf32> to vector<1x1x32xf32>
    %97 = vector.shape_cast %89 : vector<1x32xf32> to vector<1x1x32xf32>
    %98 = vector.shape_cast %90 : vector<1x32xf32> to vector<1x1x32xf32>
    %99 = vector.shape_cast %91 : vector<1x32xf32> to vector<1x1x32xf32>
    %100 = tpu.concatenate %92, %93, %94, %95, %96, %97, %98, %99 in 0 : vector<1x1x32xf32>, vector<1x1x32xf32>, vector<1x1x32xf32>, vector<1x1x32xf32>, vector<1x1x32xf32>, vector<1x1x32xf32>, vector<1x1x32xf32>, vector<1x1x32xf32> -> vector<8x1x32xf32>
    %101 = vector.extract_strided_slice %62 {offsets = [0, 0], sizes = [16, 1], strides = [1, 1]} : vector<16x8xf32> to vector<16x1xf32>
    %102 = vector.extract_strided_slice %62 {offsets = [0, 1], sizes = [16, 1], strides = [1, 1]} : vector<16x8xf32> to vector<16x1xf32>
    %103 = vector.extract_strided_slice %62 {offsets = [0, 2], sizes = [16, 1], strides = [1, 1]} : vector<16x8xf32> to vector<16x1xf32>
    %104 = vector.extract_strided_slice %62 {offsets = [0, 3], sizes = [16, 1], strides = [1, 1]} : vector<16x8xf32> to vector<16x1xf32>
    %105 = vector.extract_strided_slice %62 {offsets = [0, 4], sizes = [16, 1], strides = [1, 1]} : vector<16x8xf32> to vector<16x1xf32>
    %106 = vector.extract_strided_slice %62 {offsets = [0, 5], sizes = [16, 1], strides = [1, 1]} : vector<16x8xf32> to vector<16x1xf32>
    %107 = vector.extract_strided_slice %62 {offsets = [0, 6], sizes = [16, 1], strides = [1, 1]} : vector<16x8xf32> to vector<16x1xf32>
    %108 = vector.extract_strided_slice %62 {offsets = [0, 7], sizes = [16, 1], strides = [1, 1]} : vector<16x8xf32> to vector<16x1xf32>
    %109 = vector.shape_cast %101 : vector<16x1xf32> to vector<1x16x1xf32>
    %110 = vector.shape_cast %102 : vector<16x1xf32> to vector<1x16x1xf32>
    %111 = vector.shape_cast %103 : vector<16x1xf32> to vector<1x16x1xf32>
    %112 = vector.shape_cast %104 : vector<16x1xf32> to vector<1x16x1xf32>
    %113 = vector.shape_cast %105 : vector<16x1xf32> to vector<1x16x1xf32>
    %114 = vector.shape_cast %106 : vector<16x1xf32> to vector<1x16x1xf32>
    %115 = vector.shape_cast %107 : vector<16x1xf32> to vector<1x16x1xf32>
    %116 = vector.shape_cast %108 : vector<16x1xf32> to vector<1x16x1xf32>
    %117 = tpu.concatenate %109, %110, %111, %112, %113, %114, %115, %116 in 0 : vector<1x16x1xf32>, vector<1x16x1xf32>, vector<1x16x1xf32>, vector<1x16x1xf32>, vector<1x16x1xf32>, vector<1x16x1xf32>, vector<1x16x1xf32>, vector<1x16x1xf32> -> vector<8x16x1xf32>
    %118 = vector.extract_strided_slice %63 {offsets = [0, 0], sizes = [16, 1], strides = [1, 1]} : vector<16x8xf32> to vector<16x1xf32>
    %119 = vector.extract_strided_slice %63 {offsets = [0, 1], sizes = [16, 1], strides = [1, 1]} : vector<16x8xf32> to vector<16x1xf32>
    %120 = vector.extract_strided_slice %63 {offsets = [0, 2], sizes = [16, 1], strides = [1, 1]} : vector<16x8xf32> to vector<16x1xf32>
    %121 = vector.extract_strided_slice %63 {offsets = [0, 3], sizes = [16, 1], strides = [1, 1]} : vector<16x8xf32> to vector<16x1xf32>
    %122 = vector.extract_strided_slice %63 {offsets = [0, 4], sizes = [16, 1], strides = [1, 1]} : vector<16x8xf32> to vector<16x1xf32>
    %123 = vector.extract_strided_slice %63 {offsets = [0, 5], sizes = [16, 1], strides = [1, 1]} : vector<16x8xf32> to vector<16x1xf32>
    %124 = vector.extract_strided_slice %63 {offsets = [0, 6], sizes = [16, 1], strides = [1, 1]} : vector<16x8xf32> to vector<16x1xf32>
    %125 = vector.extract_strided_slice %63 {offsets = [0, 7], sizes = [16, 1], strides = [1, 1]} : vector<16x8xf32> to vector<16x1xf32>
    %126 = vector.shape_cast %118 : vector<16x1xf32> to vector<1x16x1xf32>
    %127 = vector.shape_cast %119 : vector<16x1xf32> to vector<1x16x1xf32>
    %128 = vector.shape_cast %120 : vector<16x1xf32> to vector<1x16x1xf32>
    %129 = vector.shape_cast %121 : vector<16x1xf32> to vector<1x16x1xf32>
    %130 = vector.shape_cast %122 : vector<16x1xf32> to vector<1x16x1xf32>
    %131 = vector.shape_cast %123 : vector<16x1xf32> to vector<1x16x1xf32>
    %132 = vector.shape_cast %124 : vector<16x1xf32> to vector<1x16x1xf32>
    %133 = vector.shape_cast %125 : vector<16x1xf32> to vector<1x16x1xf32>
    %134 = tpu.concatenate %126, %127, %128, %129, %130, %131, %132, %133 in 0 : vector<1x16x1xf32>, vector<1x16x1xf32>, vector<1x16x1xf32>, vector<1x16x1xf32>, vector<1x16x1xf32>, vector<1x16x1xf32>, vector<1x16x1xf32>, vector<1x16x1xf32> -> vector<8x16x1xf32>
    %135 = vector.broadcast %83 : vector<8x1x32xf32> to vector<8x16x32xf32>
    %136 = vector.broadcast %64 : vector<1x16x1xf32> to vector<8x16x32xf32>
    %137 = arith.mulf %135, %136 : vector<8x16x32xf32>
    %138 = math.exp %137 : vector<8x16x32xf32>
    %139 = vector.broadcast %117 : vector<8x16x1xf32> to vector<8x16x32xf32>
    %140 = vector.broadcast %100 : vector<8x1x32xf32> to vector<8x16x32xf32>
    %141 = arith.mulf %139, %140 : vector<8x16x32xf32>
    %142 = vector.extract_strided_slice %138 {offsets = [0, 0, 0], sizes = [1, 16, 32], strides = [1, 1, 1]} : vector<8x16x32xf32> to vector<1x16x32xf32>
    %143 = vector.shape_cast %142 : vector<1x16x32xf32> to vector<16x32xf32>
    %144 = arith.mulf %143, %66 : vector<16x32xf32>
    %145 = vector.extract_strided_slice %141 {offsets = [0, 0, 0], sizes = [1, 16, 32], strides = [1, 1, 1]} : vector<8x16x32xf32> to vector<1x16x32xf32>
    %146 = vector.shape_cast %145 : vector<1x16x32xf32> to vector<16x32xf32>
    %147 = arith.addf %144, %146 : vector<16x32xf32>
    %148 = vector.extract_strided_slice %138 {offsets = [1, 0, 0], sizes = [1, 16, 32], strides = [1, 1, 1]} : vector<8x16x32xf32> to vector<1x16x32xf32>
    %149 = vector.shape_cast %148 : vector<1x16x32xf32> to vector<16x32xf32>
    %150 = arith.mulf %149, %147 : vector<16x32xf32>
    %151 = vector.extract_strided_slice %141 {offsets = [1, 0, 0], sizes = [1, 16, 32], strides = [1, 1, 1]} : vector<8x16x32xf32> to vector<1x16x32xf32>
    %152 = vector.shape_cast %151 : vector<1x16x32xf32> to vector<16x32xf32>
    %153 = arith.addf %150, %152 : vector<16x32xf32>
    %154 = vector.extract_strided_slice %138 {offsets = [2, 0, 0], sizes = [1, 16, 32], strides = [1, 1, 1]} : vector<8x16x32xf32> to vector<1x16x32xf32>
    %155 = vector.shape_cast %154 : vector<1x16x32xf32> to vector<16x32xf32>
    %156 = arith.mulf %155, %153 : vector<16x32xf32>
    %157 = vector.extract_strided_slice %141 {offsets = [2, 0, 0], sizes = [1, 16, 32], strides = [1, 1, 1]} : vector<8x16x32xf32> to vector<1x16x32xf32>
    %158 = vector.shape_cast %157 : vector<1x16x32xf32> to vector<16x32xf32>
    %159 = arith.addf %156, %158 : vector<16x32xf32>
    %160 = vector.extract_strided_slice %138 {offsets = [3, 0, 0], sizes = [1, 16, 32], strides = [1, 1, 1]} : vector<8x16x32xf32> to vector<1x16x32xf32>
    %161 = vector.shape_cast %160 : vector<1x16x32xf32> to vector<16x32xf32>
    %162 = arith.mulf %161, %159 : vector<16x32xf32>
    %163 = vector.extract_strided_slice %141 {offsets = [3, 0, 0], sizes = [1, 16, 32], strides = [1, 1, 1]} : vector<8x16x32xf32> to vector<1x16x32xf32>
    %164 = vector.shape_cast %163 : vector<1x16x32xf32> to vector<16x32xf32>
    %165 = arith.addf %162, %164 : vector<16x32xf32>
    %166 = vector.extract_strided_slice %138 {offsets = [4, 0, 0], sizes = [1, 16, 32], strides = [1, 1, 1]} : vector<8x16x32xf32> to vector<1x16x32xf32>
    %167 = vector.shape_cast %166 : vector<1x16x32xf32> to vector<16x32xf32>
    %168 = arith.mulf %167, %165 : vector<16x32xf32>
    %169 = vector.extract_strided_slice %141 {offsets = [4, 0, 0], sizes = [1, 16, 32], strides = [1, 1, 1]} : vector<8x16x32xf32> to vector<1x16x32xf32>
    %170 = vector.shape_cast %169 : vector<1x16x32xf32> to vector<16x32xf32>
    %171 = arith.addf %168, %170 : vector<16x32xf32>
    %172 = vector.extract_strided_slice %138 {offsets = [5, 0, 0], sizes = [1, 16, 32], strides = [1, 1, 1]} : vector<8x16x32xf32> to vector<1x16x32xf32>
    %173 = vector.shape_cast %172 : vector<1x16x32xf32> to vector<16x32xf32>
    %174 = arith.mulf %173, %171 : vector<16x32xf32>
    %175 = vector.extract_strided_slice %141 {offsets = [5, 0, 0], sizes = [1, 16, 32], strides = [1, 1, 1]} : vector<8x16x32xf32> to vector<1x16x32xf32>
    %176 = vector.shape_cast %175 : vector<1x16x32xf32> to vector<16x32xf32>
    %177 = arith.addf %174, %176 : vector<16x32xf32>
    %178 = vector.extract_strided_slice %138 {offsets = [6, 0, 0], sizes = [1, 16, 32], strides = [1, 1, 1]} : vector<8x16x32xf32> to vector<1x16x32xf32>
    %179 = vector.shape_cast %178 : vector<1x16x32xf32> to vector<16x32xf32>
    %180 = arith.mulf %179, %177 : vector<16x32xf32>
    %181 = vector.extract_strided_slice %141 {offsets = [6, 0, 0], sizes = [1, 16, 32], strides = [1, 1, 1]} : vector<8x16x32xf32> to vector<1x16x32xf32>
    %182 = vector.shape_cast %181 : vector<1x16x32xf32> to vector<16x32xf32>
    %183 = arith.addf %180, %182 : vector<16x32xf32>
    %184 = vector.extract_strided_slice %138 {offsets = [7, 0, 0], sizes = [1, 16, 32], strides = [1, 1, 1]} : vector<8x16x32xf32> to vector<1x16x32xf32>
    %185 = vector.shape_cast %184 : vector<1x16x32xf32> to vector<16x32xf32>
    %186 = arith.mulf %185, %183 : vector<16x32xf32>
    %187 = vector.extract_strided_slice %141 {offsets = [7, 0, 0], sizes = [1, 16, 32], strides = [1, 1, 1]} : vector<8x16x32xf32> to vector<1x16x32xf32>
    %188 = vector.shape_cast %187 : vector<1x16x32xf32> to vector<16x32xf32>
    %189 = arith.addf %186, %188 : vector<16x32xf32>
    %190 = vector.shape_cast %147 : vector<16x32xf32> to vector<1x16x32xf32>
    %191 = vector.shape_cast %153 : vector<16x32xf32> to vector<1x16x32xf32>
    %192 = vector.shape_cast %159 : vector<16x32xf32> to vector<1x16x32xf32>
    %193 = vector.shape_cast %165 : vector<16x32xf32> to vector<1x16x32xf32>
    %194 = vector.shape_cast %171 : vector<16x32xf32> to vector<1x16x32xf32>
    %195 = vector.shape_cast %177 : vector<16x32xf32> to vector<1x16x32xf32>
    %196 = vector.shape_cast %183 : vector<16x32xf32> to vector<1x16x32xf32>
    %197 = vector.shape_cast %189 : vector<16x32xf32> to vector<1x16x32xf32>
    %198 = tpu.concatenate %190, %191, %192, %193, %194, %195, %196, %197 in 0 : vector<1x16x32xf32>, vector<1x16x32xf32>, vector<1x16x32xf32>, vector<1x16x32xf32>, vector<1x16x32xf32>, vector<1x16x32xf32>, vector<1x16x32xf32>, vector<1x16x32xf32> -> vector<8x16x32xf32>
    %199 = vector.broadcast %134 : vector<8x16x1xf32> to vector<8x16x32xf32>
    %200 = arith.mulf %199, %198 : vector<8x16x32xf32>
    %cst_40 = arith.constant dense<0.000000e+00> : vector<8x32xf32>
    %201 = vector.multi_reduction <add>, %200, %cst_40 [1] : vector<8x16x32xf32> to vector<8x32xf32>
    %202 = arith.mulf %201, %39 : vector<8x32xf32>
    %c0_41 = arith.constant 0 : index
    %c0_42 = arith.constant 0 : index
    %c0_43 = arith.constant 0 : index
    %203 = vector.load %arg10[%c0_41, %c0_42, %c0_43] : memref<1x32x32xf32, #tpu.memory_space<vmem>>, vector<1x32x32xf32>
    %204 = vector.shape_cast %203 : vector<1x32x32xf32> to vector<32x32xf32>
    %cst_44 = arith.constant dense<0.000000e+00> : vector<8x32xf32>
    %205 = tpu.matmul %202, %204, %cst_44 {dimension_numbers = #tpu.dot_dimension_numbers<[1], [0], [0], [1], [0, 0, 1, 1], [], []>} : vector<8x32xf32>, vector<32x32xf32>, vector<8x32xf32> -> vector<8x32xf32>
    %206 = arith.addf %205, %4 : vector<8x32xf32>
    %c1_i32 = arith.constant 1 : i32
    %207 = arith.cmpi slt, %arg1, %c1_i32 : i32
    %208 = arith.extui %207 : i1 to i32
    %c0_i32_45 = arith.constant 0 : i32
    %209 = arith.cmpi ne, %208, %c0_i32_45 : i32
    scf.if %209 {
      %c0_48 = arith.constant 0 : index
      %c0_49 = arith.constant 0 : index
      %c0_50 = arith.constant 0 : index
      %213 = vector.load %arg12[%c0_48, %c0_49, %c0_50] : memref<1x8x32xf32, #tpu.memory_space<vmem>>, vector<1x8x32xf32>
      %214 = vector.shape_cast %213 : vector<1x8x32xf32> to vector<8x32xf32>
      %215 = vector.shape_cast %206 : vector<8x32xf32> to vector<1x8x32xf32>
      tpu.vector_store %arg12[%c0_48, %c0_49, %c0_50], %215 {strides = array<i32>} : memref<1x8x32xf32, #tpu.memory_space<vmem>>, vector<1x8x32xf32>,
    } else {
    }
    %c1_i32_46 = arith.constant 1 : i32
    %210 = arith.cmpi eq, %arg1, %c1_i32_46 : i32
    %211 = arith.extui %210 : i1 to i32
    %c0_i32_47 = arith.constant 0 : i32
    %212 = arith.cmpi ne, %211, %c0_i32_47 : i32
    scf.if %212 {
      %213 = arith.mulf %206, %206 : vector<8x32xf32>
      %cst_48 = arith.constant dense<0.000000e+00> : vector<8xf32>
      %214 = vector.multi_reduction <add>, %213, %cst_48 [1] : vector<8x32xf32> to vector<8xf32>
      %215 = vector.shape_cast %214 : vector<8xf32> to vector<8x1xf32>
      %cst_49 = arith.constant 3.200000e+01 : f32
      %216 = vector.broadcast %cst_49 : f32 to vector<8x1xf32>
      %217 = arith.divf %215, %216 : vector<8x1xf32>
      %cst_50 = arith.constant 9.99999974E-6 : f32
      %218 = vector.broadcast %cst_50 : f32 to vector<8x1xf32>
      %219 = arith.addf %217, %218 : vector<8x1xf32>
      %220 = math.rsqrt %219 : vector<8x1xf32>
      %221 = vector.broadcast %220 : vector<8x1xf32> to vector<8x32xf32>
      %222 = arith.mulf %206, %221 : vector<8x32xf32>
      %c0_51 = arith.constant 0 : index
      %c0_52 = arith.constant 0 : index
      %223 = vector.load %arg11[%c0_51, %c0_52] : memref<1x32xf32, #tpu.memory_space<vmem>>, vector<1x32xf32>
      %224 = vector.broadcast %223 : vector<1x32xf32> to vector<8x32xf32>
      %225 = arith.mulf %222, %224 : vector<8x32xf32>
      %c0_53 = arith.constant 0 : index
      %c0_54 = arith.constant 0 : index
      %c0_55 = arith.constant 0 : index
      %226 = vector.load %arg12[%c0_53, %c0_54, %c0_55] : memref<1x8x32xf32, #tpu.memory_space<vmem>>, vector<1x8x32xf32>
      %227 = vector.shape_cast %226 : vector<1x8x32xf32> to vector<8x32xf32>
      %228 = vector.shape_cast %225 : vector<8x32xf32> to vector<1x8x32xf32>
      tpu.vector_store %arg12[%c0_53, %c0_54, %c0_55], %228 {strides = array<i32>} : memref<1x8x32xf32, #tpu.memory_space<vmem>>, vector<1x8x32xf32>,
    } else {
    }
    return
  }
  func.func @transform_0(%arg0: i32, %arg1: i32) -> (i32, i32, i32) {
    %c0_i32 = arith.constant 0 : i32
    %c0_i32_0 = arith.constant 0 : i32
    %c0_i32_1 = arith.constant 0 : i32
    return %arg0, %c0_i32, %c0_i32_0 : i32, i32, i32
  }
  func.func @transform_1(%arg0: i32, %arg1: i32) -> (i32, i32, i32) {
    %c0_i32 = arith.constant 0 : i32
    %c0_i32_0 = arith.constant 0 : i32
    %c0_i32_1 = arith.constant 0 : i32
    return %arg1, %c0_i32, %c0_i32_0 : i32, i32, i32
  }
  func.func @transform_2(%arg0: i32, %arg1: i32) -> (i32, i32, i32) {
    %c0_i32 = arith.constant 0 : i32
    %c0_i32_0 = arith.constant 0 : i32
    %c0_i32_1 = arith.constant 0 : i32
    return %arg1, %c0_i32, %c0_i32_0 : i32, i32, i32
  }
  func.func @transform_3(%arg0: i32, %arg1: i32) -> (i32, i32, i32) {
    %c0_i32 = arith.constant 0 : i32
    %c0_i32_0 = arith.constant 0 : i32
    %c0_i32_1 = arith.constant 0 : i32
    return %arg1, %c0_i32, %c0_i32_0 : i32, i32, i32
  }
  func.func @transform_4(%arg0: i32, %arg1: i32) -> (i32, i32, i32) {
    %c0_i32 = arith.constant 0 : i32
    %c0_i32_0 = arith.constant 0 : i32
    %c0_i32_1 = arith.constant 0 : i32
    return %arg1, %c0_i32, %c0_i32_0 : i32, i32, i32
  }
  func.func @transform_5(%arg0: i32, %arg1: i32) -> (i32, i32, i32) {
    %c0_i32 = arith.constant 0 : i32
    %c0_i32_0 = arith.constant 0 : i32
    %c0_i32_1 = arith.constant 0 : i32
    return %arg1, %c0_i32, %c0_i32_0 : i32, i32, i32
  }
  func.func @transform_6(%arg0: i32, %arg1: i32) -> (i32, i32, i32) {
    %c0_i32 = arith.constant 0 : i32
    %c0_i32_0 = arith.constant 0 : i32
    %c0_i32_1 = arith.constant 0 : i32
    return %arg1, %c0_i32, %c0_i32_0 : i32, i32, i32
  }
  func.func @transform_7(%arg0: i32, %arg1: i32) -> (i32, i32, i32) {
    %c0_i32 = arith.constant 0 : i32
    %c0_i32_0 = arith.constant 0 : i32
    %c0_i32_1 = arith.constant 0 : i32
    return %arg1, %c0_i32, %c0_i32_0 : i32, i32, i32
  }
  func.func @transform_8(%arg0: i32, %arg1: i32) -> (i32, i32, i32) {
    %c0_i32 = arith.constant 0 : i32
    %c0_i32_0 = arith.constant 0 : i32
    %c0_i32_1 = arith.constant 0 : i32
    return %arg1, %c0_i32, %c0_i32_0 : i32, i32, i32
  }
  func.func @transform_9(%arg0: i32, %arg1: i32) -> (i32, i32) {
    %c0_i32 = arith.constant 0 : i32
    %c0_i32_0 = arith.constant 0 : i32
    %c0_i32_1 = arith.constant 0 : i32
    return %c0_i32, %c0_i32_0 : i32, i32
  }
  func.func @transform_10(%arg0: i32, %arg1: i32) -> (i32, i32, i32) {
    %c0_i32 = arith.constant 0 : i32
    %c0_i32_0 = arith.constant 0 : i32
    %c0_i32_1 = arith.constant 0 : i32
    return %arg0, %c0_i32, %c0_i32_0 : i32, i32, i32
  }
}

</mosaic_0001>

<bundles_post_ra>
// kernel: pmamba_encoder.1
= control target key start
LH: loop header
LB: loop body
LE: loop exit
PB: predicated region body
PF: predicated region fallthrough
CT: control target
= control target key end

     0   :  { %s2525_s0 = inlined_call_operand.vmem [shape: f32[2,8,32], index: 0, kind: input, shape index: {}]   ;;  %s2526_s1 = inlined_call_operand.vmem [shape: f32[2,1,32], index: 1, kind: input, shape index: {}]   ;;  %s2527_s2 = inlined_call_operand.vmem [shape: f32[2,32,64], index: 2, kind: input, shape index: {}]   ;;  %s2528_s3 = inlined_call_operand.vmem [shape: f32[2,32,4], index: 3, kind: input, shape index: {}]   ;;  %s2529_s4 = inlined_call_operand.vmem [shape: f32[2,32,32], index: 4, kind: input, shape index: {}]   ;;  %s2530_s5 = inlined_call_operand.vmem [shape: f32[2,4,32], index: 5, kind: input, shape index: {}]   ;;  %s2531_s6 = inlined_call_operand.vmem [shape: f32[2,1,32], index: 6, kind: input, shape index: {}]   ;;  %s2532_s7 = inlined_call_operand.vmem [shape: f32[2,16,1], index: 7, kind: input, shape index: {}]   ;;  %s2533_s8 = inlined_call_operand.vmem [shape: f32[2,32,32], index: 8, kind: input, shape index: {}]   ;;  %s2534_s9 = inlined_call_operand.vmem [shape: f32[1,32], index: 9, kind: input, shape index: {}]   ;;  %s2535_s10 = inlined_call_operand.hbm [shape: f32[2,8,32], index: 10, kind: output, shape index: {}]  }
   0x1   :  { %2549 = sst [smem:[#allocation16_spill]] %s2525_s0 }
   0x2   :  { %2550 = sst [smem:[#allocation17_spill]] %s2527_s2 }
   0x3   :  { %2551 = sst [smem:[#allocation18_spill]] %s2528_s3 }
   0x4   :  { %2552 = sst [smem:[#allocation19_spill]] %s2535_s10 }
   0x5   :  { %15 = vsyncpa [#allocation3], 0 }
   0x6   :  { %17 = vsyncpa [#allocation3 + $0x1], 0  ;;  %s2140_s13 = smov 0   ;;  %s2142_s14 = smov 0  }
   0x7   :  { %s2144_s15 = smov 0   ;;  %s2146_s16 = smov 0  }
   0x8   :  { %s2148_s17 = smov 0   ;;  %s2150_s18 = smov 0  }
   0x9   :  { %s2152_s19 = smov 0   ;;  %s2154_s20 = smov 0  }
   0xa LB: > { %2553 = sst [smem:[#allocation5_spill]] %s2042_s13  ;;  %s1717_s21 = sadd.s32 4294967295, %s2070_s20   ;;  %s2070_s20 = sphi %s2154_s20, %s23_s20   ;;  %s2066_s19 = sphi %s2152_s19, %s2584_s19   ;;  %s2062_s18 = sphi %s2150_s18, %s2583_s18   ;;  %s2058_s17 = sphi %s2148_s17, %s2582_s17   ;;  %s2054_s16 = sphi %s2146_s16, %s2581_s16   ;;  %s2050_s15 = sphi %s2144_s15, %s2580_s15   ;;  %s2046_s14 = sphi %s2142_s14, %s2579_s14   ;;  %s2042_s13 = sphi %s2140_s13, %s2578_s13  }
   0xb   : > { %2554 = sst [smem:[#allocation6_spill]] %s2046_s14  ;;  %s1718_s22 = sadd.s32 4294967294, %s2070_s20  }
   0xc   : > { %2555 = sst [smem:[#allocation7_spill]] %s2050_s15  ;;  %s32_s23 = sadd.s32 1, %s2062_s18 }
   0xd   : > { %2556 = sst [smem:[#allocation8_spill]] %s2062_s18  ;;  %p33_p0 = scmp.ge.s32.totalorder %s32_s23, 2 }
   0xe   : > { %2557 = sst [smem:[#allocation9_spill]] %s2066_s19  ;;  %s35_s24 = sadd.s32 1, %s2066_s19 }
   0xf   : > { %2558 = sst [smem:[#allocation10_spill]] %s2070_s20  ;;  %p307_p1 = scmp.ne.s32.totalorder %s2050_s15, %s2046_s14 }
  0x10   : > { %p308_p2 = scmp.eq.s32.totalorder %s1717_s21, 3  ;;  %s2586_s23 = smov (%p33_p0, %s32_s23), 0 }
  0x11   : > { %2559 = sst [smem:[#allocation11_spill]] %s2586_s23  ;;  %s2588_s24 = smov (!%p33_p0, %s35_s24), %s2066_s19 }
  0x12   : > { %p2189_p3 = por %p308_p2, %p307_p1  ;;  %p313_p4 = scmp.ne.s32.totalorder %s2046_s14, %s2042_s13 }
  0x13   : > { %p37_p5 = scmp.ge.s32.totalorder %s2588_s24, 2  ;;  %p314_p6 = scmp.eq.s32.totalorder %s1718_s22, 3 }
  0x14   : > { %s2560_s25 = scalar_select %p2189_p3, 1, 0 }
  0x15   : > { %p1721_p7 = scmp.ge.s32.totalorder %s2070_s20, 1  ;;  %p401_p8 = scmp.lt.s32.totalorder %s2070_s20, 5 }
  0x16   : > { %2561 = sst [smem:[#allocation12_spill]] %s2560_s25  ;;  %s2590_s24 = smov (%p37_p5, %s2588_s24), 0 }
  0x17   : > { %2562 = sst [smem:[#allocation13_spill]] %s2590_s24  ;;  %p2199_p9 = por %p314_p6, %p313_p4 }
  0x18   : > { %p402_p10 = pnand %p1721_p7, %p401_p8  ;;  %s294_s27 = ssub.s32 %s2066_s19, %s2590_s24 }
  0x19   : > { %s2563_s26 = scalar_select %p2199_p9, 1, 0 }
  0x1a   : > { %s297_s28 = sadd.s32 1, %s2050_s15  ;;  %p295_p11 = scmp.eq.s32.totalorder %s294_s27, 0 }
  0x1b   : > { %2564 = sst [smem:[#allocation14_spill]] %s2563_s26  ;;  %405 = sbr.rel (%p402_p10) target bundleno = 1425 (0x591), region = 60 }
  0x1c   : > { %s2207_s29 = scalar_select %p295_p11, %s2050_s15, %s297_s28  }
  0x1d   : > { %s2539_s30 = sand.u32 (!%p402_p10), 1, %s2046_s14   ;;  %p473_p12 = scmp.lt.s32.totalorder (!%p402_p10), %s2058_s17, 1 }
  0x1e   : > { %2565 = sst [smem:[#allocation15_spill]] %s2207_s29  ;;  %s1722_s11 = sshll.u32 (!%p402_p10), %s2539_s30, 3 }
  0x1f   : > { %p477_p13 = scmp.lt.s32.totalorder (!%p402_p10), %s2054_s16, 1  ;;  %s2566_s0 = sld [smem:[#allocation16_spill]] (!%p402_p10) }
  0x20   : > { %s2567_s2 = sld [smem:[#allocation17_spill]] (!%p402_p10)  ;;  %s2568_s3 = sld [smem:[#allocation18_spill]] (!%p402_p10) }
  0x21   : > { %p1735_p0 = scmp.ne.s32.totalorder (!%p402_p10), %s2054_s16, 0 }
  0x22   : > { %s474_s12 = scalar_select %p473_p12, %s2058_s17, 1 }
  0x23   : > { %s2216_s21 = scalar_select %p477_p13, %s2054_s16, 1 }
  0x24   : > { %s1723_s22 = sshll.u32 %s474_s12, 3  ;;  %s2260_s12 = scalar_lea.vmem [#allocation2], %s1722_s11  ;;  %vm517_vm0 = vcmask (!%p1735_p0), 261120  }
  0x25   : > { %s476_s24 = scalar_lea.vmem %s2566_s0, %s1723_s22  ;;  %s1755_s29 = sshll.u32 %s2216_s21, 5 }
  0x26   : > { %s1730_s30 = sshll.u32 %s2216_s21, 2  ;;  %s484_s13 = scalar_lea.vmem %s2567_s2, %s1755_s29  ;;  %v516_v0 = vld [vmem:[%s476_s24] sm:$0xff] (!%p1735_p0) }
  0x27   : > { %s2233_s25 = scalar_lea.vmem %s2568_s3, %s1755_s29  ;;  %s2238_s27 = scalar_lea.vmem %s2529_s4, %s1755_s29  ;;  %518 = vst.msk [vmem:[%s2260_s12] sm:$0xff] (!%p1735_p0), %vm517_vm0, %v516_v0 }
  0x28   : > { %s2243_s19 = scalar_lea.vmem %s2530_s5, %s1730_s30  ;;  %s501_s15 = scalar_lea.vmem %s2531_s6, %s2216_s21 }
  0x29   : > { %s1758_s26 = sshll.u32 %s2216_s21, 4  ;;  %s2258_s14 = scalar_lea.vmem %s2533_s8, %s1755_s29 }
  0x2a   : > { %s2253_s10 = scalar_lea.vmem %s2532_s7, %s1758_s26  ;;  %515 = sbr.rel (%p1735_p0) target bundleno = 49 (0x31), region = 64 }
  0x31 PF: > { %v519_v1 = vld [vmem:[%s2260_s12] sm:$0xff]  ;;  %vm521_vm1 = vcmask 261120   ;;  %v540_v6 = vld [vmem:[%s484_s13 + $0x10] sm:$0xff]  ;;  %v2072_v7 = vmov 0.0|0.0   ;;  %v541_v9 = vld [vmem:[%s484_s13 + $0x18] sm:$0xff]  ;;  %vm2073_vm2 = vmmov 0   ;;  %s2569_s3 = scalar_lea.vmem %s2526_s1, %s2216_s21 }
  0x32   : > { %v520_v2 = vmul.f32 %v519_v1, %v519_v1  ;;  %v538_v4 = vld [vmem:[%s484_s13] sm:$0xff]  ;;  %v539_v5 = vld [vmem:[%s484_s13 + $0x8] sm:$0xff]  ;;  %1828 = vmatprep.subr.bf16.mxu0 %v2072_v7  ;;  %v2074_v10 = vmov 0.0   ;;  %1834 = vmatprep.subr.bf16.mxu1 %v2072_v7  ;;  %v1832_v11 = vpack.c.bf16 %v541_v9, %v540_v6  ;;  %v624_v22 = vld [vmem:[%s2233_s25 + $0x10] sm:$0xff]  ;;  %v2075_v26 = vmov 0   ;;  %s2076_s13 = smov 127  }
  0x33   : > { %v1829_v8 = vpack.c.bf16 %v539_v5, %v538_v4  ;;  %1790 = vmatprep.mubr.msk.f32.mxu0 %vm2073_vm2, %v2074_v10  ;;  %1801 = vmatprep.mubr.msk.f32.mxu1 %vm2073_vm2, %v2074_v10  ;;  %v1736_v16 = vld [vmem:[%s2569_s3] ss:$0 sm:$0xff]  ;;  %v623_v20 = vld [vmem:[%s2233_s25 + $0x8] sm:$0xff]  ;;  %v625_v23 = vld [vmem:[%s2233_s25 + $0x18] sm:$0xff]  ;;  %vm711_vm3 = vcmask 1043456   ;;  %vm707_vm4 = vcmask 31744  }
  0x34   : > { %v522_v3 = vsel %vm521_vm1, %v520_v2, 0.0  ;;  %v622_v19 = vld [vmem:[%s2233_s25] sm:$0xff]  ;;  %v1838_v24 = vpack.c.bf16 %v625_v23, %v624_v22  ;;  %v895_v25 = vld [vmem:[%s2253_s10 + $0x8] sm:$0xff]  ;;  %1930 = vset.pattern.permute.xlu1 %v2075_v26  ;;  %1929 = vset.pattern.permute.xlu0 %v2075_v26  ;;  %v795_v37 = vld [vmem:[%s2238_s27 + $0x10] sm:$0xff]  ;;  %s2077_s18 = smov 126   ;;  %s2078_s24 = smov 125  }
  0x35   : > { %523 = vadd.xlane.f32.xlu0 %v522_v3  ;;  %1830 = vmatpush3.bf16.msra.mxu0 %v1829_v8  ;;  %v1835_v21 = vpack.c.bf16 %v623_v20, %v622_v19  ;;  %v793_v35 = vld [vmem:[%s2238_s27] sm:$0xff]  ;;  %v794_v36 = vld [vmem:[%s2238_s27 + $0x8] sm:$0xff]  ;;  %v796_v38 = vld [vmem:[%s2238_s27 + $0x18] sm:$0xff]  ;;  %s2079_s25 = smov 123   ;;  %s2080_s29 = smov 124   ;;  %vm1425_vm6 = vcmask 1041409  }
  0x36   : > { %1831 = vmatprep.subr.bf16.mxu0 %v2072_v7  ;;  %1026 = vperm.xlu1 %1930, %v895_v25   ;;  %v699_v39 = vld [vmem:[%s2243_s19] sm:$0xf]  ;;  %s2081_s30 = smov 122   ;;  %s2082_s11 = smov 121   ;;  %vm1428_vm7 = vcmask 1042434   ;;  %vm1431_vm8 = vcmask 1043459  }
  0x37   : > { %1836 = vmatpush3.bf16.msra.mxu1 %v1835_v21  ;;  %v894_v40 = vld [vmem:[%s2253_s10] sm:$0xff]  ;;  %s2083_s27 = smov 96   ;;  %vm1434_vm9 = vcmask 1044484   ;;  %vm1437_vm10 = vcmask 1045509   ;;  %vm1440_vm11 = vcmask 1046534   ;;  %vm1443_vm12 = vcmask 1047559  }
  0x38   : > { %1837 = vmatprep.subr.bf16.mxu1 %v2072_v7  ;;  %v1739_v20 = vld [vmem:[%s501_s15] ss:$0 sm:$0xff]  ;;  %p1748_p1 = scmp.ge.s32.totalorder %s2054_s16, 1 }
  0x39   : > { %1833 = vmatpush3.bf16.msra.mxu0 %v1832_v11 }
  0x3a   : > { %1804 = vmatprep.subr.mxu0 %v2074_v10 }
  0x3b   : > { %1839 = vmatpush3.bf16.msra.mxu1 %v1838_v24 }
  0x4b   : > { %1021 = vperm.xlu0 %1929, %v894_v40  }
  0xb5   : > { %v2313_v47 = vpop.permute.xlu1 %1026 }
  0xc2   : > { %v524_v12 = vpop.xlane.xlu0 %523 }
  0xc3   : > { %v526_v13 = vmul.f32 0.03125, %v524_v12 }
  0xc5   : > { %v527_v14 = vadd.f32 1e-05, %v526_v13 }
  0xc7   : > { %1931 = vrsqrt.f32 %v527_v14 }
  0xca   : > { %v2315_v50 = vpop.permute.xlu0 %1021 }
  0xd1   : > { %v1932_v15 = vpop.eup %1931 }
  0xd2   : > { %v529_v17 = vmul.f32 %v1932_v15, %v519_v1 }
  0xd4   : > { %v537_v18 = vmul.f32 %v1736_v16, %v529_v17 }
  0xd6   : > { %1791 = vmatmul.mubr.msk.f32.vlgmr.msra.gmra.mrb[0].mxu0 %vm521_vm1, %v537_v18 }
  0xd7   : > { %1806 = vmatprep.mubr.msk.f32.mxu0 %vm2073_vm2, %v2074_v10  ;;  %1805 = vmatpush3.msk.msra.mxu0 %vm711_vm3, %v699_v39 }
  0xd8   : > { %1840 = vmatprep.subr.bf16.mxu0 %v2072_v7 }
 0x1a9   : > { %v611_v27 = vpop.f32.mrb[0].mxu0 }
 0x1aa   : > { %v615_v28 = vsub.f32 0.0, %v611_v27  ;;  %v1792_v29 = vpop.f32.mrb[1].mxu0 }
 0x1ab   : > { %v1412_v29 = vld [vmem:[%s2258_s14] sm:$0xff] }
 0x1ac   : > { %v616_v30 = vmul.f32 1.442695, %v615_v28 }
 0x1ae   : > { %1933 = vpow2.f32 %v616_v30  ;;  %v1413_v30 = vld [vmem:[%s2258_s14 + $0x8] sm:$0xff] }
 0x1b8   : > { %v1934_v31 = vpop.eup %1933 }
 0x1b9   : > { %v618_v32 = vadd.f32 1.0, %v1934_v31  ;;  %v1841_v31 = vpack.c.bf16 %v1413_v30, %v1412_v29 }
 0x1bb   : > { %1935 = vrcp.f32 %v618_v32  ;;  %v1414_v32 = vld [vmem:[%s2258_s14 + $0x10] sm:$0xff] }
 0x1c5   : > { %v1936_v33 = vpop.eup %1935 }
 0x1c6   : > { %v2288_v34 = vmul.f32 %v1936_v33, %v611_v27  ;;  %v1415_v33 = vld [vmem:[%s2258_s14 + $0x18] sm:$0xff] }
 0x1c8   : > { %1802 = vmatmul.mubr.msk.f32.vlgmr.msra.gmra.mrb[0].mxu1 %vm521_vm1, %v2288_v34  ;;  %1809 = vmatprep.subr.msk.mxu1 %vm521_vm1, %v2288_v34  ;;  %v1373_v15 = vrot.slane %v2288_v34, 1  ;;  %v1374_v17 = vrot.slane %v2288_v34, 2  ;;  %v1376_v18 = vrot.slane %v2288_v34, 4  ;;  %v1375_v19 = vrot.slane %v2288_v34, 3 }
 0x1c9   : > { %1810 = vmatpush3.xpose.msk.msra.mxu1 %vm521_vm1, %v2288_v34  ;;  %1811 = vmatprep.mubr.msk.f32.mxu1 %vm521_vm1, %v793_v35  ;;  %v1378_v21 = vrot.slane %v2288_v34, 6  ;;  %v1377_v22 = vrot.slane %v2288_v34, 5  ;;  %v1379_v27 = vrot.slane %v2288_v34, 7  ;;  %v1844_v35 = vpack.c.bf16 %v1415_v33, %v1414_v32 }
 0x1cc   : > { %1812 = vmatmul.mubr.msk.f32.vlgmr.msra.gmra.mrb[2].mxu1 %vm521_vm1, %v794_v36 }
 0x1cd   : > { %1814 = vmatprep.mubr.msk.f32.mxu1 %vm521_vm1, %v795_v37 }
 0x1d0   : > { %1815 = vmatmul.mubr.msk.f32.gmra.mrb[4].mxu1 %vm521_vm1, %v796_v38  ;;  %v987_v38 = vlaneseq }
 0x1d2   : > { %v988_v39 = vshrl.u32 %v987_v38, 7 }
 0x29b   : > { %v695_v41 = vpop.f32.mrb[0].mxu1 }
 0x29c   : > { %v1803_v42 = vpop.f32.mrb[1].mxu1  ;;  %1807 = vmatmul.mubr.msk.f32.vlgmr.msra.gmra.mrb[2].mxu0 %vm707_vm4, %v695_v41 }
 0x29d   : > { %1825 = vmatprep.mubr.msk.f32.mxu0 %vm2073_vm2, %v2074_v10  ;;  %1842 = vmatpush3.bf16.msra.mxu0 %v1841_v31  ;;  %v2339_v42 = vsub.s32 0, %v988_v39 }
 0x29e   : > { %1843 = vmatprep.subr.bf16.mxu0 %v2072_v7 }
 0x29f   : > { %v1813_v43 = vpop.f32.mrb[2].mxu1 }
 0x2a0   : > { %1082 = vperm.xlu0 %1929, %v1813_v43   ;;  %931 = vrot.lane.b32.xlu1 %v1813_v43, %s2076_s13  ;;  %v875_v44 = vpop.f32.mrb[3].mxu1 }
 0x2a1   : > { %1845 = vmatpush3.bf16.msra.mxu0 %v1844_v35 }
 0x2a3   : > { %v1816_v45 = vpop.f32.mrb[4].mxu1 }
 0x2a4   : > { %935 = vrot.lane.b32.xlu1 %v1813_v43, %s2077_s18  ;;  %929 = vrot.lane.b32.xlu0 %v875_v44, %s2076_s13  ;;  %v885_v46 = vpop.f32.mrb[5].mxu1 }
 0x2a8   : > { %939 = vrot.lane.b32.xlu1 %v1813_v43, %s2078_s24  ;;  %945 = vrot.lane.b32.xlu0 %v875_v44, %s2079_s25 }
 0x2ac   : > { %943 = vrot.lane.b32.xlu1 %v1813_v43, %s2080_s29  ;;  %949 = vrot.lane.b32.xlu0 %v875_v44, %s2081_s30 }
 0x2b0   : > { %947 = vrot.lane.b32.xlu1 %v1813_v43, %s2079_s25  ;;  %953 = vrot.lane.b32.xlu0 %v875_v44, %s2082_s11 }
 0x2b4   : > { %951 = vrot.lane.b32.xlu1 %v1813_v43, %s2081_s30  ;;  %959 = vrot.lane.b32.xlu0 %v885_v46, %s2076_s13 }
 0x2b8   : > { %955 = vrot.lane.b32.xlu1 %v1813_v43, %s2082_s11  ;;  %963 = vrot.lane.b32.xlu0 %v885_v46, %s2077_s18 }
 0x2bc   : > { %933 = vrot.lane.b32.xlu1 %v875_v44, %s2077_s18  ;;  %967 = vrot.lane.b32.xlu0 %v885_v46, %s2078_s24 }
 0x2c0   : > { %937 = vrot.lane.b32.xlu1 %v875_v44, %s2078_s24  ;;  %971 = vrot.lane.b32.xlu0 %v885_v46, %s2080_s29 }
 0x2c4   : > { %941 = vrot.lane.b32.xlu1 %v875_v44, %s2080_s29  ;;  %975 = vrot.lane.b32.xlu0 %v885_v46, %s2079_s25 }
 0x2c8   : > { %1078 = vperm.xlu1 %1930, %v875_v44   ;;  %979 = vrot.lane.b32.xlu0 %v885_v46, %s2081_s30 }
 0x2cc   : > { %961 = vrot.lane.b32.xlu1 %v1816_v45, %s2076_s13  ;;  %983 = vrot.lane.b32.xlu0 %v885_v46, %s2082_s11 }
 0x2d0   : > { %965 = vrot.lane.b32.xlu1 %v1816_v45, %s2077_s18  ;;  %1226 = vperm.xlu0 %1929, %v1816_v45  }
 0x2d4   : > { %969 = vrot.lane.b32.xlu1 %v1816_v45, %s2078_s24 }
 0x2d8   : > { %973 = vrot.lane.b32.xlu1 %v1816_v45, %s2080_s29 }
 0x2dc   : > { %977 = vrot.lane.b32.xlu1 %v1816_v45, %s2079_s25 }
 0x2e0   : > { %981 = vrot.lane.b32.xlu1 %v1816_v45, %s2081_s30 }
 0x2e4   : > { %985 = vrot.lane.b32.xlu1 %v1816_v45, %s2082_s11 }
 0x2e8   : > { %1222 = vperm.xlu1 %1930, %v885_v46  }
 0x312   : > { %v932_v48 = vpop.permute.xlu1 %931 }
 0x313   : > { %1090 = vperm.xlu0 %1929, %v932_v48  }
 0x316   : > { %v936_v49 = vpop.permute.xlu1 %935 }
 0x317   : > { %1098 = vperm.xlu0 %1929, %v936_v49  }
 0x31a   : > { %v940_v51 = vpop.permute.xlu1 %939 }
 0x31b   : > { %1106 = vperm.xlu0 %1929, %v940_v51  }
 0x31e   : > { %v944_v52 = vpop.permute.xlu1 %943 }
 0x31f   : > { %1114 = vperm.xlu0 %1929, %v944_v52   ;;  %v2317_v53 = vpop.permute.xlu0 %1082 }
 0x322   : > { %v948_v54 = vpop.permute.xlu1 %947 }
 0x323   : > { %1122 = vperm.xlu0 %1929, %v948_v54   ;;  %v930_v55 = vpop.permute.xlu0 %929 }
 0x324   : > { %1086 = vperm.xlu1 %1930, %v930_v55  }
 0x326   : > { %v952_v56 = vpop.permute.xlu1 %951 }
 0x327   : > { %1130 = vperm.xlu0 %1929, %v952_v56   ;;  %v946_v57 = vpop.permute.xlu0 %945 }
 0x32a   : > { %v956_v58 = vpop.permute.xlu1 %955 }
 0x32b   : > { %1138 = vperm.xlu0 %1929, %v956_v58   ;;  %v950_v59 = vpop.permute.xlu0 %949 }
 0x32e   : > { %v934_v60 = vpop.permute.xlu1 %933 }
 0x32f   : > { %1094 = vperm.xlu1 %1930, %v934_v60   ;;  %v954_v62 = vpop.permute.xlu0 %953 }
 0x332   : > { %v938_v61 = vpop.permute.xlu1 %937 }
 0x333   : > { %1102 = vperm.xlu1 %1930, %v938_v61   ;;  %v960_v0 = vpop.permute.xlu0 %959 }
 0x336   : > { %v942_v63 = vpop.permute.xlu1 %941 }
 0x337   : > { %1110 = vperm.xlu1 %1930, %v942_v63   ;;  %v964_v1 = vpop.permute.xlu0 %963 }
 0x33b   : > { %1118 = vperm.xlu1 %1930, %v946_v57   ;;  %v968_v2 = vpop.permute.xlu0 %967 }
 0x33f   : > { %1126 = vperm.xlu1 %1930, %v950_v59   ;;  %v972_v5 = vpop.permute.xlu0 %971 }
 0x343   : > { %1134 = vperm.xlu1 %1930, %v954_v62   ;;  %v976_v8 = vpop.permute.xlu0 %975 }
 0x347   : > { %v2319_v3 = vpop.permute.xlu1 %1078  ;;  %1230 = vperm.xlu1 %1930, %v960_v0   ;;  %v980_v11 = vpop.permute.xlu0 %979 }
 0x34b   : > { %v962_v4 = vpop.permute.xlu1 %961  ;;  %1238 = vperm.xlu1 %1930, %v964_v1   ;;  %v984_v13 = vpop.permute.xlu0 %983 }
 0x34c   : > { %1234 = vperm.xlu0 %1929, %v962_v4  }
 0x34f   : > { %v966_v6 = vpop.permute.xlu1 %965  ;;  %1246 = vperm.xlu1 %1930, %v968_v2   ;;  %v2353_v58 = vpop.permute.xlu0 %1226 }
 0x350   : > { %1242 = vperm.xlu0 %1929, %v966_v6  }
 0x353   : > { %v970_v9 = vpop.permute.xlu1 %969  ;;  %1254 = vperm.xlu1 %1930, %v972_v5  }
 0x354   : > { %1250 = vperm.xlu0 %1929, %v970_v9  }
 0x357   : > { %v974_v10 = vpop.permute.xlu1 %973  ;;  %1262 = vperm.xlu1 %1930, %v976_v8  }
 0x358   : > { %1258 = vperm.xlu0 %1929, %v974_v10  }
 0x35b   : > { %v978_v12 = vpop.permute.xlu1 %977  ;;  %1270 = vperm.xlu1 %1930, %v980_v11  }
 0x35c   : > { %1266 = vperm.xlu0 %1929, %v978_v12  }
 0x35f   : > { %v982_v14 = vpop.permute.xlu1 %981  ;;  %1278 = vperm.xlu1 %1930, %v984_v13  }
 0x360   : > { %1274 = vperm.xlu0 %1929, %v982_v14  }
 0x363   : > { %v986_v16 = vpop.permute.xlu1 %985  ;;  %1382 = vrot.lane.b32.xlu1 %v1373_v15, %s2083_s27 }
 0x364   : > { %1282 = vperm.xlu0 %1929, %v986_v16  }
 0x367   : > { %1380 = vrot.lane.b32.xlu1 %v2288_v34, %s2083_s27  ;;  %v2365_v6 = vpop.permute.xlu1 %1222 }
 0x368   : > { %1384 = vrot.lane.b32.xlu0 %v1374_v17, %s2083_s27 }
 0x36b   : > { %1388 = vrot.lane.b32.xlu1 %v1376_v18, %s2083_s27 }
 0x36c   : > { %1386 = vrot.lane.b32.xlu0 %v1375_v19, %s2083_s27 }
 0x36f   : > { %v781_v23 = vpop.f32.mrb[2].mxu0  ;;  %1392 = vrot.lane.b32.xlu1 %v1378_v21, %s2083_s27 }
 0x370   : > { %v782_v24 = vadd.f32 %v1739_v20, %v781_v23  ;;  %1390 = vrot.lane.b32.xlu0 %v1377_v22, %s2083_s27  ;;  %v1808_v25 = vpop.f32.mrb[3].mxu0 }
 0x372   : > { %v786_v26 = vmin.f32 %v782_v24, 20.0  ;;  %vm785_vm5 = vcmp.gt.f32.partialorder %v782_v24, 20.0 }
 0x374   : > { %v787_v28 = vmul.f32 1.442695, %v786_v26  ;;  %1394 = vrot.lane.b32.xlu0 %v1379_v27, %s2083_s27 }
 0x376   : > { %1937 = vpow2.f32 %v787_v28 }
 0x380   : > { %v1938_v36 = vpop.eup %1937 }
 0x381   : > { %v789_v37 = vadd.f32 1.0, %v1938_v36 }
 0x383   : > { %1939 = vlog2.f32 %v789_v37 }
 0x38d   : > { %v1940_v40 = vpop.eup %1939 }
 0x38e   : > { %v791_v41 = vmul.f32 0.6931472, %v1940_v40 }
 0x390   : > { %v2341_v43 = vsel %vm785_vm5, %v782_v24, %v791_v41 }
 0x391   : > { %v898_v44 = vrot.slane %v2341_v43, 1  ;;  %v990_v7 = vrot.slane %v2341_v43, %v2339_v42  ;;  %v900_v51 = vrot.slane %v2341_v43, 2  ;;  %v2357_v59 = vmul.f32 %v2341_v43, %v2288_v34 }
 0x392   : > { %v902_v61 = vrot.slane %v2341_v43, 3  ;;  %v1091_v63 = vpop.permute.xlu0 %1090  ;;  %v904_v17 = vrot.slane %v2341_v43, 4  ;;  %v906_v35 = vrot.slane %v2341_v43, 5 }
 0x393   : > { %v994_v45 = vrot.slane %v898_v44, %v2339_v42  ;;  %v1029_v46 = vmul.f32 %v2315_v50, %v990_v7  ;;  %v1030_v49 = vmul.f32 %v2313_v47, %v990_v7  ;;  %v998_v56 = vrot.slane %v900_v51, %v2339_v42 }
 0x394   : > { %v1144_v0 = vrot.slane %v2357_v59, %v2339_v42  ;;  %v1002_v4 = vrot.slane %v902_v61, %v2339_v42  ;;  %v913_v9 = vrot.slane %v2357_v59, 1  ;;  %v1006_v24 = vrot.slane %v904_v17, %v2339_v42 }
 0x395   : > { %v1045_v48 = vmul.f32 1.442695, %v1029_v46  ;;  %v1032_v52 = vmul.f32 %v2313_v47, %v994_v45  ;;  %v1047_v54 = vmul.f32 1.442695, %v1030_v49  ;;  %v1031_v55 = vmul.f32 %v2315_v50, %v994_v45 }
 0x396   : > { %v1034_v62 = vmul.f32 %v2313_v47, %v998_v56  ;;  %v1033_v1 = vmul.f32 %v2315_v50, %v998_v56  ;;  %v1174_v11 = vmul.f32 %v1144_v0, %v2317_v53  ;;  %v1173_v13 = vmul.f32 %v1144_v0, %v2319_v3  ;;  %v1099_v14 = vpop.permute.xlu0 %1098 }
 0x397   : > { %1941 = vpow2.f32 %v1045_v48  ;;  %v1051_v57 = vmul.f32 1.442695, %v1032_v52  ;;  %v1049_v60 = vmul.f32 1.442695, %v1031_v55  ;;  %v1035_v16 = vmul.f32 %v2315_v50, %v1002_v4 }
 0x398   : > { %1943 = vpow2.f32 %v1047_v54  ;;  %v1055_v8 = vmul.f32 1.442695, %v1034_v62  ;;  %v1053_v10 = vmul.f32 1.442695, %v1033_v1  ;;  %v1036_v20 = vmul.f32 %v2313_v47, %v1002_v4 }
 0x399   : > { %1945 = vpow2.f32 %v1051_v57  ;;  %v1148_v21 = vrot.slane %v913_v9, %v2339_v42  ;;  %v1057_v23 = vmul.f32 1.442695, %v1035_v16  ;;  %v915_v25 = vrot.slane %v2357_v59, 2 }
 0x39a   : > { %1947 = vpow2.f32 %v1049_v60  ;;  %v1059_v28 = vmul.f32 1.442695, %v1036_v20  ;;  %v1107_v30 = vpop.permute.xlu0 %1106  ;;  %v1037_v33 = vmul.f32 %v2315_v50, %v1006_v24  ;;  %v1038_v39 = vmul.f32 %v2313_v47, %v1006_v24 }
 0x39b   : > { %1949 = vpow2.f32 %v1055_v8  ;;  %v1176_v29 = vmul.f32 %v1148_v21, %v1091_v63  ;;  %v1152_v36 = vrot.slane %v915_v25, %v2339_v42  ;;  %v1010_v48 = vrot.slane %v906_v35, %v2339_v42 }
 0x39c   : > { %1951 = vpow2.f32 %v1053_v10  ;;  %v1061_v46 = vmul.f32 1.442695, %v1037_v33  ;;  %v917_v49 = vrot.slane %v2357_v59, 3  ;;  %v1063_v54 = vmul.f32 1.442695, %v1038_v39 }
 0x39d   : > { %1953 = vpow2.f32 %v1057_v23  ;;  %v1178_v55 = vmul.f32 %v1152_v36, %v1099_v14  ;;  %v908_v57 = vrot.slane %v2341_v43, 6  ;;  %v1039_v61 = vmul.f32 %v2315_v50, %v1010_v48 }
 0x39e   : > { %1955 = vpow2.f32 %v1059_v28  ;;  %v1115_v7 = vpop.permute.xlu0 %1114  ;;  %v1156_v62 = vrot.slane %v917_v49, %v2339_v42  ;;  %v1040_v0 = vmul.f32 %v2313_v47, %v1010_v48 }
 0x39f   : > { %1957 = vpow2.f32 %v1061_v46  ;;  %v1014_v8 = vrot.slane %v908_v57, %v2339_v42  ;;  %v1065_v10 = vmul.f32 1.442695, %v1039_v61 }
 0x3a0   : > { %1959 = vpow2.f32 %v1063_v54  ;;  %v1180_v14 = vmul.f32 %v1156_v62, %v1107_v30  ;;  %v921_v30 = vrot.slane %v2357_v59, 5 }
 0x3a1   : > { %v1942_v2 = vpop.eup %1941  ;;  %v1041_v17 = vmul.f32 %v2315_v50, %v1014_v8  ;;  %1961 = vpow2.f32 %v1065_v10 }
 0x3a2   : > { %v1944_v5 = vpop.eup %1943  ;;  %v1189_v34 = vmul.f32 0.0, %v1942_v2  ;;  %v1123_v2 = vpop.permute.xlu0 %1122 }
 0x3a3   : > { %v1190_v12 = vmul.f32 0.0, %v1944_v5  ;;  %v1087_v18 = vpop.permute.xlu1 %1086  ;;  %v1946_v53 = vpop.eup %1945 }
 0x3a4   : > { %v2374_v19 = vadd.f32 %v1189_v34, %v1173_v13  ;;  %v1948_v22 = vpop.eup %1947  ;;  %v1175_v31 = vmul.f32 %v1148_v21, %v1087_v18  ;;  %v1067_v13 = vmul.f32 1.442695, %v1040_v0  ;;  %v910_v21 = vrot.slane %v2341_v43, 7 }
 0x3a5   : > { %v2370_v15 = vadd.f32 %v1190_v12, %v1174_v11  ;;  %v1950_v40 = vpop.eup %1949  ;;  %v919_v11 = vrot.slane %v2357_v59, 4 }
 0x3a6   : > { %v1193_v27 = vmul.f32 %v1948_v22, %v2374_v19  ;;  %v1952_v44 = vpop.eup %1951  ;;  %v2409_v18 = vpop.permute.xlu0 %1130  ;;  %1963 = vpow2.f32 %v1067_v13 }
 0x3a7   : > { %v1194_v3 = vmul.f32 %v1946_v53, %v2370_v15  ;;  %v1954_v1 = vpop.eup %1953  ;;  %v1160_v53 = vrot.slane %v919_v11, %v2339_v42  ;;  %v1286_v39 = vmul.f32 %v2353_v58, %v2370_v15 }
 0x3a8   : > { %v2387_v38 = vadd.f32 %v1193_v27, %v1175_v31  ;;  %v1956_v4 = vpop.eup %1955  ;;  %v1069_v27 = vmul.f32 1.442695, %v1041_v17 }
 0x3a9   : > { %v2382_v32 = vadd.f32 %v1194_v3, %v1176_v29  ;;  %v1042_v3 = vmul.f32 %v2313_v47, %v1014_v8  ;;  %v1958_v23 = vpop.eup %1957  ;;  %v1018_v29 = vrot.slane %v910_v21, %v2339_v42  ;;  %v1182_v33 = vmul.f32 %v1160_v53, %v1115_v7 }
 0x3aa   : > { %v1197_v52 = vmul.f32 %v1952_v44, %v2387_v38  ;;  %v1960_v24 = vpop.eup %1959  ;;  %v2421_v35 = vpop.permute.xlu0 %1138  ;;  %1965 = vpow2.f32 %v1069_v27  ;;  %v1164_v44 = vrot.slane %v921_v30, %v2339_v42 }
 0x3ab   : > { %v1198_v45 = vmul.f32 %v1950_v40, %v2382_v32  ;;  %v1071_v43 = vmul.f32 1.442695, %v1042_v3  ;;  %v1044_v7 = vmul.f32 %v2313_v47, %v1018_v29  ;;  %v1962_v48 = vpop.eup %1961 }
 0x3ac   : > { %v1184_v0 = vmul.f32 %v1164_v44, %v1123_v2 }
 0x3ad   : > { %v2397_v60 = vadd.f32 %v1198_v45, %v1178_v55  ;;  %1967 = vpow2.f32 %v1071_v43  ;;  %v1302_v55 = vsel %vm521_vm1, %v1286_v39, 0.0 }
 0x3ae   : > { %v1095_v26 = vpop.permute.xlu1 %1094 }
 0x3af   : > { %v1177_v41 = vmul.f32 %v1152_v36, %v1095_v26  ;;  %v1202_v9 = vmul.f32 %v1956_v4, %v2397_v60 }
 0x3b1   : > { %v2394_v56 = vadd.f32 %v1197_v52, %v1177_v41  ;;  %v2411_v20 = vadd.f32 %v1202_v9, %v1180_v14  ;;  %v1043_v41 = vmul.f32 %v2315_v50, %v1018_v29  ;;  %v923_v52 = vrot.slane %v2357_v59, 6 }
 0x3b2   : > { %v1103_v37 = vpop.permute.xlu1 %1102 }
 0x3b3   : > { %v1179_v5 = vmul.f32 %v1156_v62, %v1103_v37  ;;  %v1201_v34 = vmul.f32 %v1954_v1, %v2394_v56  ;;  %v1206_v28 = vmul.f32 %v1960_v24, %v2411_v20  ;;  %v1285_v37 = vmul.f32 %v2365_v6, %v2374_v19 }
 0x3b4   : > { %v1073_v54 = vmul.f32 1.442695, %v1043_v41  ;;  %v1075_v62 = vmul.f32 1.442695, %v1044_v7  ;;  %v925_v24 = vrot.slane %v2357_v59, 7 }
 0x3b5   : > { %v1203_v16 = vadd.f32 %v1201_v34, %v1179_v5  ;;  %v1208_v40 = vadd.f32 %v1206_v28, %v1182_v33  ;;  %v1301_v50 = vsel %vm521_vm1, %v1285_v37, 0.0  ;;  %v1168_v34 = vrot.slane %v923_v52, %v2339_v42 }
 0x3b6   : > { %v1111_v51 = vpop.permute.xlu1 %1110  ;;  %v1303_v5 = vadd.f32 %v1302_v55, %v1301_v50  ;;  %1969 = vpow2.f32 %v1073_v54  ;;  %v1172_v41 = vrot.slane %v925_v24, %v2339_v42 }
 0x3b7   : > { %v1181_v25 = vmul.f32 %v1160_v53, %v1111_v51  ;;  %v1205_v26 = vmul.f32 %v1958_v23, %v1203_v16  ;;  %v1964_v51 = vpop.eup %1963  ;;  %1971 = vpow2.f32 %v1075_v62  ;;  %v1186_v30 = vmul.f32 %v1168_v34, %v2409_v18 }
 0x3b8   : > { %v1210_v15 = vmul.f32 %v1964_v51, %v1208_v40  ;;  %v1966_v9 = vpop.eup %1965  ;;  %v1304_v23 = vrot.slane %v1303_v5, 4 }
 0x3b9   : > { %v1207_v36 = vadd.f32 %v1205_v26, %v1181_v25  ;;  %v1968_v21 = vpop.eup %1967 }
 0x3ba   : > { %v1119_v63 = vpop.permute.xlu1 %1118  ;;  %v1212_v8 = vadd.f32 %v1210_v15, %v1184_v0  ;;  %v1305_v39 = vadd.f32 %v1304_v23, %v1303_v5  ;;  %v1188_v0 = vmul.f32 %v1172_v41, %v2421_v35 }
 0x3bb   : > { %v1183_v6 = vmul.f32 %v1164_v44, %v1119_v63  ;;  %v1209_v58 = vmul.f32 %v1962_v48, %v1207_v36 }
 0x3bc   : > { %v1214_v26 = vmul.f32 %v1968_v21, %v1212_v8  ;;  %v1306_v42 = vrot.slane %v1305_v39, 2 }
 0x3bd   : > { %v1211_v4 = vadd.f32 %v1209_v58, %v1183_v6 }
 0x3be   : > { %v2406_v12 = vpop.permute.xlu1 %1126  ;;  %v1216_v44 = vadd.f32 %v1214_v26, %v1186_v30 }
 0x3bf   : > { %v1213_v3 = vmul.f32 %v1966_v9, %v1211_v4 }
 0x3c2   : > { %v2415_v22 = vpop.permute.xlu1 %1134 }
 0x3c6   : > { %v1231_v31 = vpop.permute.xlu1 %1230 }
 0x3c7   : > { %v1287_v45 = vmul.f32 %v1231_v31, %v2387_v38 }
 0x3c9   : > { %v1310_v38 = vsel %vm521_vm1, %v1287_v45, 0.0 }
 0x3ca   : > { %v1239_v46 = vpop.permute.xlu1 %1238 }
 0x3cb   : > { %v1235_v49 = vpop.permute.xlu0 %1234  ;;  %v1289_v57 = vmul.f32 %v1239_v46, %v2394_v56 }
 0x3cc   : > { %v1288_v19 = vmul.f32 %v1235_v49, %v2382_v32  ;;  %v1970_v49 = vpop.eup %1969 }
 0x3cd   : > { %v1319_v10 = vsel %vm521_vm1, %v1289_v57, 0.0 }
 0x3ce   : > { %v1311_v47 = vsel %vm521_vm1, %v1288_v19, 0.0  ;;  %v1247_v61 = vpop.permute.xlu1 %1246  ;;  %v1972_v19 = vpop.eup %1971 }
 0x3cf   : > { %v1312_v1 = vadd.f32 %v1311_v47, %v1310_v38  ;;  %v1243_v63 = vpop.permute.xlu0 %1242  ;;  %v1291_v11 = vmul.f32 %v1247_v61, %v1203_v16  ;;  %v1218_v55 = vmul.f32 %v1972_v19, %v1216_v44 }
 0x3d0   : > { %v1290_v32 = vmul.f32 %v1243_v63, %v2397_v60  ;;  %v1185_v60 = vmul.f32 %v1168_v34, %v2406_v12  ;;  %v1307_v34 = vadd.f32 %v1306_v42, %v1305_v39 }
 0x3d1   : > { %v1313_v14 = vrot.slane %v1312_v1, 4  ;;  %v1328_v16 = vsel %vm521_vm1, %v1291_v11, 0.0 }
 0x3d2   : > { %v1320_v56 = vsel %vm521_vm1, %v1290_v32, 0.0  ;;  %v1255_v13 = vpop.permute.xlu1 %1254 }
 0x3d3   : > { %v1321_v2 = vadd.f32 %v1320_v56, %v1319_v10  ;;  %v1251_v17 = vpop.permute.xlu0 %1250  ;;  %v1293_v27 = vmul.f32 %v1255_v13, %v1207_v36  ;;  %v1314_v31 = vadd.f32 %v1313_v14, %v1312_v1  ;;  %v1220_v10 = vadd.f32 %v1218_v55, %v1188_v0 }
 0x3d4   : > { %v1292_v53 = vmul.f32 %v1251_v17, %v2411_v20  ;;  %v1215_v20 = vadd.f32 %v1213_v3, %v1185_v60 }
 0x3d5   : > { %v1322_v25 = vrot.slane %v1321_v2, 4  ;;  %v1337_v45 = vsel %vm521_vm1, %v1293_v27, 0.0  ;;  %v1315_v6 = vrot.slane %v1314_v31, 2 }
 0x3d6   : > { %v1329_v28 = vsel %vm521_vm1, %v1292_v53, 0.0  ;;  %v1263_v29 = vpop.permute.xlu1 %1262  ;;  %v1217_v15 = vmul.f32 %v1970_v49, %v1215_v20 }
 0x3d7   : > { %v1323_v43 = vadd.f32 %v1322_v25, %v1321_v2  ;;  %v1330_v33 = vadd.f32 %v1329_v28, %v1328_v16  ;;  %v1259_v12 = vpop.permute.xlu0 %1258  ;;  %v1295_v46 = vmul.f32 %v1263_v29, %v1211_v4  ;;  %v1316_v4 = vadd.f32 %v1315_v6, %v1314_v31 }
 0x3d8   : > { %v1294_v37 = vmul.f32 %v1259_v12, %v1208_v40  ;;  %v1187_v40 = vmul.f32 %v1172_v41, %v2415_v22  ;;  %v1308_v25 = vrot.slane %v1307_v34, 1 }
 0x3d9   : > { %v1331_v59 = vrot.slane %v1330_v33, 4  ;;  %v1324_v48 = vrot.slane %v1323_v43, 2  ;;  %v1346_v38 = vsel %vm521_vm1, %v1295_v46, 0.0  ;;  %v1317_v60 = vrot.slane %v1316_v4, 1 }
 0x3da   : > { %v1338_v36 = vsel %vm521_vm1, %v1294_v37, 0.0  ;;  %v1271_v7 = vpop.permute.xlu1 %1270  ;;  %v1219_v22 = vadd.f32 %v1217_v15, %v1187_v40 }
 0x3db   : > { %v1332_v18 = vadd.f32 %v1331_v59, %v1330_v33  ;;  %v1339_v51 = vadd.f32 %v1338_v36, %v1337_v45  ;;  %v1267_v52 = vpop.permute.xlu0 %1266  ;;  %v1297_v50 = vmul.f32 %v1271_v7, %v1215_v20  ;;  %v1325_v61 = vadd.f32 %v1324_v48, %v1323_v43 }
 0x3dc   : > { %v1296_v58 = vmul.f32 %v1267_v52, %v1212_v8  ;;  %v1318_v43 = vadd.f32 %v1317_v60, %v1316_v4 }
 0x3dd   : > { %v1340_v54 = vrot.slane %v1339_v51, 4  ;;  %v1333_v62 = vrot.slane %v1332_v18, 2  ;;  %v1355_v8 = vsel %vm521_vm1, %v1297_v50, 0.0  ;;  %v1326_v2 = vrot.slane %v1325_v61, 1 }
 0x3de   : > { %v1347_v57 = vsel %vm521_vm1, %v1296_v58, 0.0  ;;  %v1279_v47 = vpop.permute.xlu1 %1278 }
 0x3df   : > { %v1341_v1 = vadd.f32 %v1340_v54, %v1339_v51  ;;  %v1348_v63 = vadd.f32 %v1347_v57, %v1346_v38  ;;  %v1275_v32 = vpop.permute.xlu0 %1274  ;;  %v1299_v56 = vmul.f32 %v1279_v47, %v1219_v22  ;;  %v1334_v17 = vadd.f32 %v1333_v62, %v1332_v18 }
 0x3e0   : > { %v1298_v5 = vmul.f32 %v1275_v32, %v1216_v44  ;;  %v1327_v29 = vadd.f32 %v1326_v2, %v1325_v61  ;;  %v1309_v44 = vadd.f32 %v1308_v25, %v1307_v34 }
 0x3e1   : > { %v1349_v9 = vrot.slane %v1348_v63, 4  ;;  %v1342_v11 = vrot.slane %v1341_v1, 2  ;;  %v1364_v16 = vsel %vm521_vm1, %v1299_v56, 0.0  ;;  %v1335_v30 = vrot.slane %v1334_v17, 1 }
 0x3e2   : > { %v1356_v13 = vsel %vm521_vm1, %v1298_v5, 0.0  ;;  %v1383_v14 = vpop.permute.xlu1 %1382 }
 0x3e3   : > { %v1350_v21 = vadd.f32 %v1349_v9, %v1348_v63  ;;  %v1357_v35 = vadd.f32 %v1356_v13, %v1355_v8  ;;  %v1283_v53 = vpop.permute.xlu0 %1282  ;;  %v1343_v23 = vadd.f32 %v1342_v11, %v1341_v1  ;;  %v1405_v41 = vmul.f32 %v1383_v14, %v1318_v43 }
 0x3e4   : > { %v1300_v3 = vmul.f32 %v1283_v53, %v1220_v10  ;;  %v1336_v36 = vadd.f32 %v1335_v30, %v1334_v17  ;;  %v1973_v17 = vld [vmem:[%s2260_s12] sm:$0xff] }
 0x3e5   : > { %v1358_v24 = vrot.slane %v1357_v35, 4  ;;  %v1351_v26 = vrot.slane %v1350_v21, 2  ;;  %v1344_v20 = vrot.slane %v1343_v23, 1  ;;  %v1424_v40 = vrot.slane %v1405_v41, 7 }
 0x3e6   : > { %v1365_v27 = vsel %vm521_vm1, %v1300_v3, 0.0  ;;  %v1381_v28 = vpop.permute.xlu1 %1380 }
 0x3e7   : > { %v1359_v31 = vadd.f32 %v1358_v24, %v1357_v35  ;;  %v1366_v33 = vadd.f32 %v1365_v27, %v1364_v16  ;;  %v1385_v12 = vpop.permute.xlu0 %1384  ;;  %v1352_v39 = vadd.f32 %v1351_v26, %v1350_v21  ;;  %v1404_v49 = vmul.f32 %v1381_v28, %v1309_v44 }
 0x3e8   : > { %v1406_v37 = vmul.f32 %v1385_v12, %v1327_v29  ;;  %v1345_v6 = vadd.f32 %v1344_v20, %v1343_v23 }
 0x3e9   : > { %v1367_v59 = vrot.slane %v1366_v33, 4  ;;  %v1360_v45 = vrot.slane %v1359_v31, 2  ;;  %v1353_v7 = vrot.slane %v1352_v39, 1  ;;  %v1426_v55 = vsel %vm1425_vm6, %v1424_v40, %v1404_v49 }
 0x3ea   : > { %v1389_v46 = vpop.permute.xlu1 %1388  ;;  %v1427_v52 = vrot.slane %v1406_v37, 6 }
 0x3eb   : > { %v1368_v48 = vadd.f32 %v1367_v59, %v1366_v33  ;;  %v1387_v18 = vpop.permute.xlu0 %1386  ;;  %v1361_v51 = vadd.f32 %v1360_v45, %v1359_v31  ;;  %v1408_v42 = vmul.f32 %v1389_v46, %v1345_v6  ;;  %v1354_v50 = vadd.f32 %v1353_v7, %v1352_v39 }
 0x3ec   : > { %v1407_v19 = vmul.f32 %v1387_v18, %v1336_v36  ;;  %v1429_v61 = vsel %vm1428_vm7, %v1427_v52, %v1426_v55 }
 0x3ed   : > { %v1362_v58 = vrot.slane %v1361_v51, 1  ;;  %v1369_v15 = vrot.slane %v1368_v48, 2  ;;  %v1433_v4 = vrot.slane %v1408_v42, 4 }
 0x3ee   : > { %v1430_v54 = vrot.slane %v1407_v19, 5  ;;  %v1393_v62 = vpop.permute.xlu1 %1392 }
 0x3ef   : > { %v1363_v38 = vadd.f32 %v1362_v58, %v1361_v51  ;;  %v1391_v57 = vpop.permute.xlu0 %1390  ;;  %v1370_v47 = vadd.f32 %v1369_v15, %v1368_v48 }
 0x3f0   : > { %v1409_v0 = vmul.f32 %v1391_v57, %v1354_v50  ;;  %v1432_v1 = vsel %vm1431_vm8, %v1430_v54, %v1429_v61 }
 0x3f1   : > { %v1410_v63 = vmul.f32 %v1393_v62, %v1363_v38  ;;  %v1371_v32 = vrot.slane %v1370_v47, 1  ;;  %v1435_v9 = vsel %vm1434_vm9, %v1433_v4, %v1432_v1 }
 0x3f2   : > { %v1436_v22 = vrot.slane %v1409_v0, 3 }
 0x3f3   : > { %v1372_v5 = vadd.f32 %v1371_v32, %v1370_v47  ;;  %v1395_v34 = vpop.permute.xlu0 %1394  ;;  %v1439_v8 = vrot.slane %v1410_v63, 2 }
 0x3f4   : > { %v1438_v10 = vsel %vm1437_vm10, %v1436_v22, %v1435_v9 }
 0x3f5   : > { %v1411_v11 = vmul.f32 %v1395_v34, %v1372_v5  ;;  %v1441_v13 = vsel %vm1440_vm11, %v1439_v8, %v1438_v10 }
 0x3f7   : > { %v1442_v56 = vrot.slane %v1411_v11, 1 }
 0x3f9   : > { %v1444_v14 = vsel %vm1443_vm12, %v1442_v56, %v1441_v13 }
 0x3fa   : > { %1826 = vmatmul.mubr.msk.f32.vlgmr.msra.gmra.mrb[4].mxu0 %vm521_vm1, %v1444_v14 }
 0x4c8   : > { %1520 = sbr.rel (%p1748_p1) target bundleno = 1233 (0x4d1), region = 68 }
 0x4cd   : > { %v1513_v2 = vpop.f32.mrb[4].mxu0 }
 0x4ce   : > { %v1514_v21 = vadd.f32 %v1973_v17, %v1513_v2  ;;  %v1827_v35 = vpop.f32.mrb[5].mxu0 }
 0x4d0   : > { %1521 = vst.msk [vmem:[%s2260_s12] sm:$0xff] %vm521_vm1, %v1514_v21 }
 0x4d1 PF: > { %p1749_p2 = scmp.ne.s32.totalorder %s2054_s16, 1 }
 0x4d2   : > { %v1526_v60 = vmul.f32 (!%p1749_p2), %v1514_v21, %v1514_v21  ;;  %v1750_v26 = vld [vmem:[%s2534_s9] ss:$0 sm:$0xff] (!%p1749_p2) }
 0x4d3   : > { %1525 = sbr.rel (%p1749_p2) target bundleno = 1399 (0x577), region = 72 }
 0x4d4   : > { %v1527_v53 = vsel (!%p1749_p2), %vm521_vm1, %v1526_v60, 0.0 }
 0x4d5   : > { %1528 = vadd.xlane.f32.xlu0 (!%p1749_p2), %v1527_v53 }
 0x562   : > { %v1529_v3 = vpop.xlane.xlu0 %1528 }
 0x563   : > { %v1530_v23 = vmul.f32 0.03125, %v1529_v3 }
 0x565   : > { %v1531_v24 = vadd.f32 1e-05, %v1530_v23 }
 0x567   : > { %1974 = vrsqrt.f32 %v1531_v24 }
 0x571   : > { %v1975_v25 = vpop.eup %1974 }
 0x572   : > { %v1533_v16 = vmul.f32 %v1975_v25, %v1514_v21 }
 0x574   : > { %v1541_v27 = vmul.f32 %v1750_v26, %v1533_v16 }
 0x576   : > { %1542 = vst.msk [vmem:[%s2260_s12] sm:$0xff] %vm521_vm1, %v1541_v27 }
 0x577 PF: > { %s2570_s16 = sld [smem:[#allocation6_spill]]  ;;  %s1752_s15 = sshll.u32 %s2058_s17, 7 }
 0x578   : > { %s2572_s20 = sld [smem:[#allocation19_spill]]  ;;  %s1557_s2 = sshll.u32 %s2260_s12, 4  ;;  %s1558_s2 = int_to_ptr.vmem [resolvable:$true] %s1557_s2 }
 0x579   : > { %s1976_s18 = scalar_lea.vmem %s1558_s2, 128  ;;  %s2084_s24 = smov [#allocation2]  }
 0x57a   : > { %p1977_p4 = scmp.ne.s32.totalorder %s1558_s2, %s1976_s18  ;;  %s1980_s25 = sshll.u32 %s2084_s24, 4  ;;  %s1981_s25 = int_to_ptr.vmem [resolvable:$false] %s1980_s25 }
 0x57b   : > { %s1982_s29 = scalar_lea.vmem %s1981_s25, 256  ;;  %p1983_p7 = scmp.lt.s32.totalorder %s1558_s2, %s1981_s25 }
 0x57c   : > { %p1978_p5 = pnand %p1977_p4, %p2189_p3  ;;  %p1984_p8 = scmp.lt.s32.totalorder %s1982_s29, %s1976_s18 }
 0x57d   : > { %s2574_s3 = sand.u32 1, %s2570_s16  }
 0x57e   : > { %s2573_s0 = smov %s2572_s20  ;;  %s2475_s14 = scalar_lea.hbm %s2572_s20, %s1752_s15 }
 0x57f   : > { %s1544_s13 = scalar_lea.sflag [#allocation3], %s2574_s3  ;;  %p1979_p6 = pneg %p1978_p5 }
 0x580   : > { %p1985_p10 = por %p1984_p8, %p1983_p7 }
 0x582   : > { %p1986_p11 = pnand %p1985_p10, %p1979_p6 }
 0x584   : > { %1989 = shalt.err (!%p1986_p11)
}
 0x585   : > { %s1990_s17 = scalar_lea.hbm %s2475_s14, 128  ;;  %s1994_s11 = scalar_lea.hbm %s2573_s0, 256 }
 0x586   : > { %p1991_p12 = scmp.ne.s32.totalorder %s2475_s14, %s1990_s17  ;;  %p1995_p1 = scmp.lt.u32.totalorder %s2475_s14, %s2573_s0 }
 0x587   : > { %p1996_p2 = scmp.lt.u32.totalorder %s1994_s11, %s1990_s17  ;;  %p1998_p5 = scmp.lt.u32.totalorder %s1990_s17, %s2475_s14 }
 0x588   : > { %p1992_p13 = pnand %p1991_p12, %p2189_p3 }
 0x589   : > { %p1997_p4 = por %p1996_p2, %p1995_p1 }
 0x58a   : > { %p1993_p0 = pneg %p1992_p13 }
 0x58b   : > { %p1999_p6 = por %p1998_p5, %p1997_p4 }
 0x58d   : > { %p2000_p7 = pnand %p1999_p6, %p1993_p0 }
 0x58f   : > { %2003 = shalt.err (!%p2000_p7)
}
 0x590   : > { %1846 = dma.vmem_to_hbm [thread:$0]  (%p2189_p3), %s1558_s2, 128, %s2475_s14, %s1544_s13  }
 0x591 PF: > { %s2575_s28 = sld [smem:[#allocation10_spill]]  ;;  %s2576_s21 = sld [smem:[#allocation5_spill]] }
 0x597   : > { %p1852_p8 = scmp.ge.s32.totalorder %s2575_s28, 2  ;;  %s1569_s16 = sand.u32 1, %s2576_s21  }
 0x598   : > { %s1570_s15 = scalar_lea.sflag [#allocation3], %s1569_s16 }
 0x599   : > { %p1849_p10 = pnand %p1852_p8, %p2199_p9 }
 0x59b   : > { %2037 = dma.done.wait (!%p1849_p10), %s1570_s15, 128  }
 0x59c   : > { %2039 = vsyncadd (!%p1849_p10), %s1570_s15, 4294967168  ;;  %s23_s20 = sadd.s32 1, %s2575_s28   ;;  %s2578_s13 = sld [smem:[#allocation6_spill]] }
 0x59d   : > { %p20_p11 = scmp.ge.s32.totalorder %s23_s20, 6   ;;  %s2579_s14 = sld [smem:[#allocation7_spill]] }
 0x59e   : > { %s2580_s15 = sld [smem:[#allocation15_spill]]  ;;  %s2581_s16 = sld [smem:[#allocation8_spill]] }
 0x59f   : > { %s2582_s17 = sld [smem:[#allocation9_spill]]  ;;  %s2583_s18 = sld [smem:[#allocation11_spill]] }
 0x5a0   : > { %s2584_s19 = sld [smem:[#allocation13_spill]]  ;;  %22 = sbr.rel (!%p20_p11) target bundleno = 10 (0xa), region = 131 }
 0x5a7   :  { %1575 = vsyncpa [#allocation3], 1 }
 0x5a8   :  { %1577 = vsyncpa [#allocation3 + $0x1], 1 }

</bundles_post_ra>
